<compile_context>
chip_gen: v7x
topology: tpu7x:2x2x1
jax: 0.10.0
libtpu: 0.0.40
codegen_flags: <defaults>
</compile_context>

<pallas_src>
import math
import jax
import jax.numpy as jnp
from jax.experimental import pallas as pl
from jax.experimental.pallas import tpu as pltpu

# ---- hyper-parameters (small shapes consistent with NetworkCNN.__init__) ----
SEQ_LEN       = 16
PRED_LEN      = 8
PATCH_LEN     = 4
STRIDE        = 4
PADDING_PATCH = 'end'
TREND         = 2

DIM       = PATCH_LEN * PATCH_LEN                       # 16
PATCH_NUM = (SEQ_LEN - PATCH_LEN) // STRIDE + 1
if PADDING_PATCH == 'end':
    PATCH_NUM += 1                                      # 5
PN_T = PATCH_NUM // TREND                               # 2
FLAT = PN_T * PATCH_LEN                                 # 8

B, C = 2, 4
N = B * C                                               # 8 (BatchNorm batch dim)


def _erf(x):
    # TODO(synk): an exact erf primitive is not guaranteed to lower in Mosaic;
    # Abramowitz & Stegun 7.1.26 rational approximation (|err| < 1.5e-7) is used.
    a1, a2, a3, a4, a5 = 0.254829592, -0.284496736, 1.421413741, -1.453152027, 1.061405429
    p = 0.3275911
    ax = jnp.abs(x)
    t = 1.0 / (1.0 + p * ax)
    poly = ((((a5 * t + a4) * t + a3) * t + a2) * t + a1) * t
    y = 1.0 - poly * jnp.exp(-ax * ax)
    return jnp.where(x >= 0.0, y, -y)


def _gelu(x):
    # erf-form GELU, matching nn.GELU() default (approximate='none')
    return 0.5 * x * (1.0 + _erf(x * 0.7071067811865476))


def _bn_rows(h, ssel, sselT, gamma, beta, inv_count, eps=1e-5):
    # Training-mode BatchNorm1d on channel-major rows (rows grouped by channel).
    # Single pass: per-row lane sums of x and x*x; a (C, R) selector matmul folds
    # same-channel rows; biased variance via E[x^2] - m^2; one rsqrt; per-row
    # scale/shift broadcast back with the transposed selector matmul.
    s_r = jnp.sum(h, axis=-1, keepdims=True)                               # (R, 1)
    q_r = jnp.sum(h * h, axis=-1, keepdims=True)                           # (R, 1)
    m_c = jnp.dot(ssel, s_r, preferred_element_type=jnp.float32) * inv_count
    e2_c = jnp.dot(ssel, q_r, preferred_element_type=jnp.float32) * inv_count
    var_c = e2_c - m_c * m_c
    scale_c = gamma * jax.lax.rsqrt(var_c + eps)                           # (C, 1)
    shift_c = beta - m_c * scale_c                                         # (C, 1)
    scale_r = jnp.dot(sselT, scale_c, preferred_element_type=jnp.float32)  # (R, 1)
    shift_r = jnp.dot(sselT, shift_c, preferred_element_type=jnp.float32)
    return h * scale_r + shift_r


def network_cnn_kernel(x_ref,
                       w1t_ref, b1_ref, g1_ref, be1_ref,
                       ssel_ref, sselT_ref,
                       cw1_ref, cb1_ref, g2_ref, be2_ref,
                       gsel_ref,
                       w2t_ref, b2_ref,
                       w2big_ref, cb2_ref, g3_ref, be3_ref,
                       s3_ref, s3T_ref,
                       w3r_ref, b3_ref, w4t_ref, b4_ref,
                       o_ref):
    x = x_ref[...]                                        # (PN*N, P), row = c*N + n
    ssel, sselT = ssel_ref[...], sselT_ref[...]

    # ---- fc1 + gelu1 + bn1 : one (PN*N, P) @ (P, D) MXU matmul ----
    h = jnp.dot(x, w1t_ref[...], preferred_element_type=jnp.float32) + b1_ref[...]
    h = _gelu(h)
    h = _bn_rows(h, ssel, sselT, g1_ref[...], be1_ref[...], 1.0 / (N * DIM))
    # h: (PN*N, D); also the residual-branch input

    # ---- conv1: depthwise Conv1d(PN, PN, k=P, stride=P, groups=PN) ----
    # = per-channel weight (pre-tiled to D lanes) * h, then stride-P block sums
    #   via one (D, P) pooling matmul.
    y = jnp.dot(h * cw1_ref[...], gsel_ref[...],
                preferred_element_type=jnp.float32) + cb1_ref[...]       # (PN*N, P)
    y = _gelu(y)
    y = _bn_rows(y, ssel, sselT, g2_ref[...], be2_ref[...], 1.0 / (N * PATCH_LEN))

    # ---- fc2 on the residual branch, then add ----
    r = jnp.dot(h, w2t_ref[...], preferred_element_type=jnp.float32) + b2_ref[...]
    y = y + r                                                            # (PN*N, P)

    # ---- conv2: pointwise Conv1d(PN -> PN//trend, 1) over the channel axis ----
    # = one (PNT*N, PN*N) @ (PN*N, P) matmul with kron(cw2, I_N).
    z = jnp.dot(w2big_ref[...], y, preferred_element_type=jnp.float32) + cb2_ref[...]
    z = _gelu(z)
    z = _bn_rows(z, s3_ref[...], s3T_ref[...], g3_ref[...], be3_ref[...],
                 1.0 / (N * PATCH_LEN))                                  # (PNT*N, P)

    # ---- flatten(-2) + fc3 folded: u[n] = b3 + sum_o z[o*N:(o+1)*N] @ w3r[o] ----
    u = b3_ref[...] + jnp.dot(z[0:N, :], w3r_ref[0],
                              preferred_element_type=jnp.float32)        # (N, 2*pred)
    for o in range(1, PN_T):                  # static, tiny unroll; no concat
        u = u + jnp.dot(z[o * N:(o + 1) * N, :], w3r_ref[o],
                        preferred_element_type=jnp.float32)
    u = _gelu(u)

    # ---- fc4 ----
    out = jnp.dot(u, w4t_ref[...], preferred_element_type=jnp.float32) + b4_ref[...]
    o_ref[...] = out.astype(o_ref.dtype)


def init_params(key):
    # deterministic, PyTorch-default-style uniform(-1/sqrt(fan_in), 1/sqrt(fan_in))
    def linear(k, fan_in, fan_out):
        k1, k2 = jax.random.split(k)
        bound = 1.0 / math.sqrt(fan_in)
        w = jax.random.uniform(k1, (fan_out, fan_in), jnp.float32, -bound, bound)
        b = jax.random.uniform(k2, (fan_out,), jnp.float32, -bound, bound)
        return w, b

    keys = jax.random.split(key, 6)
    fc1_w, fc1_b = linear(keys[0], PATCH_LEN, DIM)
    conv1_w, conv1_b = linear(keys[1], PATCH_LEN, PATCH_NUM)   # depthwise (PN,1,P) squeezed
    fc2_w, fc2_b = linear(keys[2], DIM, PATCH_LEN)
    conv2_w, conv2_b = linear(keys[3], PATCH_NUM, PN_T)        # 1x1 conv (PNT,PN,1) squeezed
    fc3_w, fc3_b = linear(keys[4], FLAT, PRED_LEN * 2)
    fc4_w, fc4_b = linear(keys[5], PRED_LEN * 2, PRED_LEN)

    eye_n = jnp.eye(N, dtype=jnp.float32)
    ones_row = jnp.ones((1, N), jnp.float32)
    # BatchNorm channel selectors for rows ordered channel*N + n
    ssel = jnp.kron(jnp.eye(PATCH_NUM, dtype=jnp.float32), ones_row)    # (PN, PN*N)
    s3 = jnp.kron(jnp.eye(PN_T, dtype=jnp.float32), ones_row)           # (PNT, PNT*N)
    # conv1: depthwise weight tiled across D lanes and repeated per batch row
    cw1_full = jnp.repeat(jnp.tile(conv1_w, (1, PATCH_LEN)), N, axis=0)  # (PN*N, D)
    cb1_full = jnp.repeat(conv1_b.reshape(PATCH_NUM, 1), N, axis=0)      # (PN*N, 1)
    # conv1 stride-P block-sum pooling matrix
    gsel = (jnp.arange(DIM)[:, None] // PATCH_LEN
            == jnp.arange(PATCH_LEN)[None, :]).astype(jnp.float32)       # (D, P)
    # conv2 as one block matmul over channel-major rows
    w2big = jnp.kron(conv2_w, eye_n)                                     # (PNT*N, PN*N)
    cb2_full = jnp.repeat(conv2_b.reshape(PN_T, 1), N, axis=0)           # (PNT*N, 1)
    # fc3 weight regrouped per conv2-output channel (folds Flatten(start_dim=-2))
    w3r = fc3_w.T.reshape(PN_T, PATCH_LEN, PRED_LEN * 2)                 # (PNT, P, 2*pred)

    ones = lambda c: jnp.ones((c, 1), jnp.float32)
    zeros = lambda c: jnp.zeros((c, 1), jnp.float32)
    return dict(
        w1t=fc1_w.T, b1=fc1_b.reshape(1, DIM),
        g1=ones(PATCH_NUM), be1=zeros(PATCH_NUM),
        ssel=ssel, sselT=ssel.T,
        cw1_full=cw1_full, cb1_full=cb1_full,
        g2=ones(PATCH_NUM), be2=zeros(PATCH_NUM),
        gsel=gsel,
        w2t=fc2_w.T, b2=fc2_b.reshape(1, PATCH_LEN),
        w2big=w2big, cb2_full=cb2_full,
        g3=ones(PN_T), be3=zeros(PN_T),
        s3=s3, s3T=s3.T,
        w3r=w3r, b3=fc3_b.reshape(1, PRED_LEN * 2),
        w4t=fc4_w.T, b4=fc4_b.reshape(1, PRED_LEN),
    )


def network_cnn_forward(x, params):
    # x: (B, seq_len, C) — same input convention as the torch module
    b, seq, c = x.shape
    n = b * c
    xc = jnp.transpose(x, (0, 2, 1)).reshape(n, seq)              # (N, I)
    if PADDING_PATCH == 'end':
        xc = jnp.pad(xc, ((0, 0), (0, STRIDE)), mode='edge')      # ReplicationPad1d((0, stride))
    starts = jnp.arange(PATCH_NUM) * STRIDE
    idx = starts[:, None] + jnp.arange(PATCH_LEN)[None, :]
    patches = xc[:, idx]                                          # (N, PN, P) == unfold
    # channel-major rows (patch_channel*N + batch) so each BatchNorm channel is a
    # contiguous, sublane-aligned 8-row block inside the kernel.
    x2 = jnp.transpose(patches, (1, 0, 2)).reshape(PATCH_NUM * n, PATCH_LEN)

    args = (x2,
            params['w1t'], params['b1'], params['g1'], params['be1'],
            params['ssel'], params['sselT'],
            params['cw1_full'], params['cb1_full'], params['g2'], params['be2'],
            params['gsel'],
            params['w2t'], params['b2'],
            params['w2big'], params['cb2_full'], params['g3'], params['be3'],
            params['s3'], params['s3T'],
            params['w3r'], params['b3'], params['w4t'], params['b4'])

    out = pl.pallas_call(
        network_cnn_kernel,
        out_shape=jax.ShapeDtypeStruct((n, PRED_LEN), jnp.float32),
        in_specs=[pl.BlockSpec(memory_space=pltpu.MemorySpace.VMEM)] * len(args),
        out_specs=pl.BlockSpec(memory_space=pltpu.MemorySpace.VMEM),
    )(*args)

    out = out.reshape(b, c, PRED_LEN)
    return jnp.transpose(out, (0, 2, 1))                          # (B, pred_len, C)


if __name__ == "__main__":
    key = jax.random.PRNGKey(0)
    k_x, k_p = jax.random.split(key)
    x = jax.random.normal(k_x, (B, SEQ_LEN, C), jnp.float32)
    params = init_params(k_p)

    y = jax.jit(lambda xx: network_cnn_forward(xx, params))(x)
    jax.block_until_ready(y)
    assert y.shape == (B, PRED_LEN, C) and y.dtype == jnp.float32
    print("KERNEL_OK")
</pallas_src>

<mosaic_0001>
module attributes {stable_mosaic.version = 11 : i64} {
  func.func @network_cnn_kernel(%arg0: memref<40x4xf32, #tpu.memory_space<vmem>>, %arg1: memref<4x16xf32, #tpu.memory_space<vmem>>, %arg2: memref<1x16xf32, #tpu.memory_space<vmem>>, %arg3: memref<5x1xf32, #tpu.memory_space<vmem>>, %arg4: memref<5x1xf32, #tpu.memory_space<vmem>>, %arg5: memref<5x40xf32, #tpu.memory_space<vmem>>, %arg6: memref<40x5xf32, #tpu.memory_space<vmem>>, %arg7: memref<40x16xf32, #tpu.memory_space<vmem>>, %arg8: memref<40x1xf32, #tpu.memory_space<vmem>>, %arg9: memref<5x1xf32, #tpu.memory_space<vmem>>, %arg10: memref<5x1xf32, #tpu.memory_space<vmem>>, %arg11: memref<16x4xf32, #tpu.memory_space<vmem>>, %arg12: memref<16x4xf32, #tpu.memory_space<vmem>>, %arg13: memref<1x4xf32, #tpu.memory_space<vmem>>, %arg14: memref<16x40xf32, #tpu.memory_space<vmem>>, %arg15: memref<16x1xf32, #tpu.memory_space<vmem>>, %arg16: memref<2x1xf32, #tpu.memory_space<vmem>>, %arg17: memref<2x1xf32, #tpu.memory_space<vmem>>, %arg18: memref<2x16xf32, #tpu.memory_space<vmem>>, %arg19: memref<16x2xf32, #tpu.memory_space<vmem>>, %arg20: memref<2x4x16xf32, #tpu.memory_space<vmem>>, %arg21: memref<1x16xf32, #tpu.memory_space<vmem>>, %arg22: memref<16x8xf32, #tpu.memory_space<vmem>>, %arg23: memref<1x8xf32, #tpu.memory_space<vmem>>, %arg24: memref<8x8xf32, #tpu.memory_space<vmem>>) attributes {dimension_semantics = [], scalar_prefetch = 0 : i64, scratch_operands = 0 : i64, tpu.core_type = #tpu.core_type<tc>} {
    %c0 = arith.constant 0 : index
    %c0_0 = arith.constant 0 : index
    %0 = vector.load %arg0[%c0, %c0_0] : memref<40x4xf32, #tpu.memory_space<vmem>>, vector<40x4xf32>
    %c0_1 = arith.constant 0 : index
    %c0_2 = arith.constant 0 : index
    %1 = vector.load %arg5[%c0_1, %c0_2] : memref<5x40xf32, #tpu.memory_space<vmem>>, vector<5x40xf32>
    %c0_3 = arith.constant 0 : index
    %c0_4 = arith.constant 0 : index
    %2 = vector.load %arg6[%c0_3, %c0_4] : memref<40x5xf32, #tpu.memory_space<vmem>>, vector<40x5xf32>
    %c0_5 = arith.constant 0 : index
    %c0_6 = arith.constant 0 : index
    %3 = vector.load %arg1[%c0_5, %c0_6] : memref<4x16xf32, #tpu.memory_space<vmem>>, vector<4x16xf32>
    %cst = arith.constant dense<0.000000e+00> : vector<40x16xf32>
    %4 = tpu.matmul %0, %3, %cst {dimension_numbers = #tpu.dot_dimension_numbers<[1], [0], [0], [1], [0, 0, 1, 1], [], []>} : vector<40x4xf32>, vector<4x16xf32>, vector<40x16xf32> -> vector<40x16xf32>
    %c0_7 = arith.constant 0 : index
    %c0_8 = arith.constant 0 : index
    %5 = vector.load %arg2[%c0_7, %c0_8] : memref<1x16xf32, #tpu.memory_space<vmem>>, vector<1x16xf32>
    %6 = vector.broadcast %5 : vector<1x16xf32> to vector<40x16xf32>
    %7 = arith.addf %4, %6 : vector<40x16xf32>
    %cst_9 = arith.constant 5.000000e-01 : f32
    %8 = vector.broadcast %cst_9 : f32 to vector<40x16xf32>
    %9 = arith.mulf %8, %7 : vector<40x16xf32>
    %cst_10 = arith.constant 0.707106769 : f32
    %10 = vector.broadcast %cst_10 : f32 to vector<40x16xf32>
    %11 = arith.mulf %7, %10 : vector<40x16xf32>
    %12 = math.absf %11 : vector<40x16xf32>
    %cst_11 = arith.constant 0.327591091 : f32
    %13 = vector.broadcast %cst_11 : f32 to vector<40x16xf32>
    %14 = arith.mulf %13, %12 : vector<40x16xf32>
    %cst_12 = arith.constant 1.000000e+00 : f32
    %15 = vector.broadcast %cst_12 : f32 to vector<40x16xf32>
    %16 = arith.addf %15, %14 : vector<40x16xf32>
    %cst_13 = arith.constant 1.000000e+00 : f32
    %17 = vector.broadcast %cst_13 : f32 to vector<40x16xf32>
    %18 = arith.divf %17, %16 : vector<40x16xf32>
    %cst_14 = arith.constant 1.06140542 : f32
    %19 = vector.broadcast %cst_14 : f32 to vector<40x16xf32>
    %20 = arith.mulf %19, %18 : vector<40x16xf32>
    %cst_15 = arith.constant -1.45315206 : f32
    %21 = vector.broadcast %cst_15 : f32 to vector<40x16xf32>
    %22 = arith.addf %20, %21 : vector<40x16xf32>
    %23 = arith.mulf %22, %18 : vector<40x16xf32>
    %cst_16 = arith.constant 1.42141378 : f32
    %24 = vector.broadcast %cst_16 : f32 to vector<40x16xf32>
    %25 = arith.addf %23, %24 : vector<40x16xf32>
    %26 = arith.mulf %25, %18 : vector<40x16xf32>
    %cst_17 = arith.constant -0.284496725 : f32
    %27 = vector.broadcast %cst_17 : f32 to vector<40x16xf32>
    %28 = arith.addf %26, %27 : vector<40x16xf32>
    %29 = arith.mulf %28, %18 : vector<40x16xf32>
    %cst_18 = arith.constant 0.254829586 : f32
    %30 = vector.broadcast %cst_18 : f32 to vector<40x16xf32>
    %31 = arith.addf %29, %30 : vector<40x16xf32>
    %32 = arith.mulf %31, %18 : vector<40x16xf32>
    %cst_19 = arith.constant 0.000000e+00 : f32
    %33 = vector.broadcast %cst_19 : f32 to vector<40x16xf32>
    %34 = arith.subf %33, %12 : vector<40x16xf32>
    %35 = arith.mulf %34, %12 : vector<40x16xf32>
    %36 = math.exp %35 : vector<40x16xf32>
    %37 = arith.mulf %32, %36 : vector<40x16xf32>
    %cst_20 = arith.constant 1.000000e+00 : f32
    %38 = vector.broadcast %cst_20 : f32 to vector<40x16xf32>
    %39 = arith.subf %38, %37 : vector<40x16xf32>
    %cst_21 = arith.constant 0.000000e+00 : f32
    %40 = vector.broadcast %cst_21 : f32 to vector<40x16xf32>
    %41 = arith.cmpf oge, %11, %40 : vector<40x16xf32>
    %cst_22 = arith.constant 0.000000e+00 : f32
    %42 = vector.broadcast %cst_22 : f32 to vector<40x16xf32>
    %43 = arith.subf %42, %39 : vector<40x16xf32>
    %44 = arith.select %41, %39, %43 : vector<40x16xi1>, vector<40x16xf32>
    %cst_23 = arith.constant 1.000000e+00 : f32
    %45 = vector.broadcast %cst_23 : f32 to vector<40x16xf32>
    %46 = arith.addf %45, %44 : vector<40x16xf32>
    %47 = arith.mulf %9, %46 : vector<40x16xf32>
    %c0_24 = arith.constant 0 : index
    %c0_25 = arith.constant 0 : index
    %48 = vector.load %arg3[%c0_24, %c0_25] : memref<5x1xf32, #tpu.memory_space<vmem>>, vector<5x1xf32>
    %c0_26 = arith.constant 0 : index
    %c0_27 = arith.constant 0 : index
    %49 = vector.load %arg4[%c0_26, %c0_27] : memref<5x1xf32, #tpu.memory_space<vmem>>, vector<5x1xf32>
    %cst_28 = arith.constant dense<0.000000e+00> : vector<40xf32>
    %50 = vector.multi_reduction <add>, %47, %cst_28 [1] : vector<40x16xf32> to vector<40xf32>
    %51 = vector.shape_cast %50 : vector<40xf32> to vector<40x1xf32>
    %52 = arith.mulf %47, %47 : vector<40x16xf32>
    %cst_29 = arith.constant dense<0.000000e+00> : vector<40xf32>
    %53 = vector.multi_reduction <add>, %52, %cst_29 [1] : vector<40x16xf32> to vector<40xf32>
    %54 = vector.shape_cast %53 : vector<40xf32> to vector<40x1xf32>
    %cst_30 = arith.constant dense<0.000000e+00> : vector<5x1xf32>
    %55 = tpu.matmul %1, %51, %cst_30 {dimension_numbers = #tpu.dot_dimension_numbers<[1], [0], [0], [1], [0, 0, 1, 1], [], []>} : vector<5x40xf32>, vector<40x1xf32>, vector<5x1xf32> -> vector<5x1xf32>
    %cst_31 = arith.constant 7.812500e-03 : f32
    %56 = vector.broadcast %cst_31 : f32 to vector<5x1xf32>
    %57 = arith.mulf %55, %56 : vector<5x1xf32>
    %cst_32 = arith.constant dense<0.000000e+00> : vector<5x1xf32>
    %58 = tpu.matmul %1, %54, %cst_32 {dimension_numbers = #tpu.dot_dimension_numbers<[1], [0], [0], [1], [0, 0, 1, 1], [], []>} : vector<5x40xf32>, vector<40x1xf32>, vector<5x1xf32> -> vector<5x1xf32>
    %cst_33 = arith.constant 7.812500e-03 : f32
    %59 = vector.broadcast %cst_33 : f32 to vector<5x1xf32>
    %60 = arith.mulf %58, %59 : vector<5x1xf32>
    %61 = arith.mulf %57, %57 : vector<5x1xf32>
    %62 = arith.subf %60, %61 : vector<5x1xf32>
    %cst_34 = arith.constant 9.99999974E-6 : f32
    %63 = vector.broadcast %cst_34 : f32 to vector<5x1xf32>
    %64 = arith.addf %62, %63 : vector<5x1xf32>
    %65 = math.rsqrt %64 : vector<5x1xf32>
    %66 = arith.mulf %48, %65 : vector<5x1xf32>
    %67 = arith.mulf %57, %66 : vector<5x1xf32>
    %68 = arith.subf %49, %67 : vector<5x1xf32>
    %cst_35 = arith.constant dense<0.000000e+00> : vector<40x1xf32>
    %69 = tpu.matmul %2, %66, %cst_35 {dimension_numbers = #tpu.dot_dimension_numbers<[1], [0], [0], [1], [0, 0, 1, 1], [], []>} : vector<40x5xf32>, vector<5x1xf32>, vector<40x1xf32> -> vector<40x1xf32>
    %cst_36 = arith.constant dense<0.000000e+00> : vector<40x1xf32>
    %70 = tpu.matmul %2, %68, %cst_36 {dimension_numbers = #tpu.dot_dimension_numbers<[1], [0], [0], [1], [0, 0, 1, 1], [], []>} : vector<40x5xf32>, vector<5x1xf32>, vector<40x1xf32> -> vector<40x1xf32>
    %71 = vector.broadcast %69 : vector<40x1xf32> to vector<40x16xf32>
    %72 = arith.mulf %47, %71 : vector<40x16xf32>
    %73 = vector.broadcast %70 : vector<40x1xf32> to vector<40x16xf32>
    %74 = arith.addf %72, %73 : vector<40x16xf32>
    %c0_37 = arith.constant 0 : index
    %c0_38 = arith.constant 0 : index
    %75 = vector.load %arg7[%c0_37, %c0_38] : memref<40x16xf32, #tpu.memory_space<vmem>>, vector<40x16xf32>
    %76 = arith.mulf %74, %75 : vector<40x16xf32>
    %c0_39 = arith.constant 0 : index
    %c0_40 = arith.constant 0 : index
    %77 = vector.load %arg11[%c0_39, %c0_40] : memref<16x4xf32, #tpu.memory_space<vmem>>, vector<16x4xf32>
    %cst_41 = arith.constant dense<0.000000e+00> : vector<40x4xf32>
    %78 = tpu.matmul %76, %77, %cst_41 {dimension_numbers = #tpu.dot_dimension_numbers<[1], [0], [0], [1], [0, 0, 1, 1], [], []>} : vector<40x16xf32>, vector<16x4xf32>, vector<40x4xf32> -> vector<40x4xf32>
    %c0_42 = arith.constant 0 : index
    %c0_43 = arith.constant 0 : index
    %79 = vector.load %arg8[%c0_42, %c0_43] : memref<40x1xf32, #tpu.memory_space<vmem>>, vector<40x1xf32>
    %80 = vector.broadcast %79 : vector<40x1xf32> to vector<40x4xf32>
    %81 = arith.addf %78, %80 : vector<40x4xf32>
    %cst_44 = arith.constant 5.000000e-01 : f32
    %82 = vector.broadcast %cst_44 : f32 to vector<40x4xf32>
    %83 = arith.mulf %82, %81 : vector<40x4xf32>
    %cst_45 = arith.constant 0.707106769 : f32
    %84 = vector.broadcast %cst_45 : f32 to vector<40x4xf32>
    %85 = arith.mulf %81, %84 : vector<40x4xf32>
    %86 = math.absf %85 : vector<40x4xf32>
    %cst_46 = arith.constant 0.327591091 : f32
    %87 = vector.broadcast %cst_46 : f32 to vector<40x4xf32>
    %88 = arith.mulf %87, %86 : vector<40x4xf32>
    %cst_47 = arith.constant 1.000000e+00 : f32
    %89 = vector.broadcast %cst_47 : f32 to vector<40x4xf32>
    %90 = arith.addf %89, %88 : vector<40x4xf32>
    %cst_48 = arith.constant 1.000000e+00 : f32
    %91 = vector.broadcast %cst_48 : f32 to vector<40x4xf32>
    %92 = arith.divf %91, %90 : vector<40x4xf32>
    %cst_49 = arith.constant 1.06140542 : f32
    %93 = vector.broadcast %cst_49 : f32 to vector<40x4xf32>
    %94 = arith.mulf %93, %92 : vector<40x4xf32>
    %cst_50 = arith.constant -1.45315206 : f32
    %95 = vector.broadcast %cst_50 : f32 to vector<40x4xf32>
    %96 = arith.addf %94, %95 : vector<40x4xf32>
    %97 = arith.mulf %96, %92 : vector<40x4xf32>
    %cst_51 = arith.constant 1.42141378 : f32
    %98 = vector.broadcast %cst_51 : f32 to vector<40x4xf32>
    %99 = arith.addf %97, %98 : vector<40x4xf32>
    %100 = arith.mulf %99, %92 : vector<40x4xf32>
    %cst_52 = arith.constant -0.284496725 : f32
    %101 = vector.broadcast %cst_52 : f32 to vector<40x4xf32>
    %102 = arith.addf %100, %101 : vector<40x4xf32>
    %103 = arith.mulf %102, %92 : vector<40x4xf32>
    %cst_53 = arith.constant 0.254829586 : f32
    %104 = vector.broadcast %cst_53 : f32 to vector<40x4xf32>
    %105 = arith.addf %103, %104 : vector<40x4xf32>
    %106 = arith.mulf %105, %92 : vector<40x4xf32>
    %cst_54 = arith.constant 0.000000e+00 : f32
    %107 = vector.broadcast %cst_54 : f32 to vector<40x4xf32>
    %108 = arith.subf %107, %86 : vector<40x4xf32>
    %109 = arith.mulf %108, %86 : vector<40x4xf32>
    %110 = math.exp %109 : vector<40x4xf32>
    %111 = arith.mulf %106, %110 : vector<40x4xf32>
    %cst_55 = arith.constant 1.000000e+00 : f32
    %112 = vector.broadcast %cst_55 : f32 to vector<40x4xf32>
    %113 = arith.subf %112, %111 : vector<40x4xf32>
    %cst_56 = arith.constant 0.000000e+00 : f32
    %114 = vector.broadcast %cst_56 : f32 to vector<40x4xf32>
    %115 = arith.cmpf oge, %85, %114 : vector<40x4xf32>
    %cst_57 = arith.constant 0.000000e+00 : f32
    %116 = vector.broadcast %cst_57 : f32 to vector<40x4xf32>
    %117 = arith.subf %116, %113 : vector<40x4xf32>
    %118 = arith.select %115, %113, %117 : vector<40x4xi1>, vector<40x4xf32>
    %cst_58 = arith.constant 1.000000e+00 : f32
    %119 = vector.broadcast %cst_58 : f32 to vector<40x4xf32>
    %120 = arith.addf %119, %118 : vector<40x4xf32>
    %121 = arith.mulf %83, %120 : vector<40x4xf32>
    %c0_59 = arith.constant 0 : index
    %c0_60 = arith.constant 0 : index
    %122 = vector.load %arg9[%c0_59, %c0_60] : memref<5x1xf32, #tpu.memory_space<vmem>>, vector<5x1xf32>
    %c0_61 = arith.constant 0 : index
    %c0_62 = arith.constant 0 : index
    %123 = vector.load %arg10[%c0_61, %c0_62] : memref<5x1xf32, #tpu.memory_space<vmem>>, vector<5x1xf32>
    %cst_63 = arith.constant dense<0.000000e+00> : vector<40xf32>
    %124 = vector.multi_reduction <add>, %121, %cst_63 [1] : vector<40x4xf32> to vector<40xf32>
    %125 = vector.shape_cast %124 : vector<40xf32> to vector<40x1xf32>
    %126 = arith.mulf %121, %121 : vector<40x4xf32>
    %cst_64 = arith.constant dense<0.000000e+00> : vector<40xf32>
    %127 = vector.multi_reduction <add>, %126, %cst_64 [1] : vector<40x4xf32> to vector<40xf32>
    %128 = vector.shape_cast %127 : vector<40xf32> to vector<40x1xf32>
    %cst_65 = arith.constant dense<0.000000e+00> : vector<5x1xf32>
    %129 = tpu.matmul %1, %125, %cst_65 {dimension_numbers = #tpu.dot_dimension_numbers<[1], [0], [0], [1], [0, 0, 1, 1], [], []>} : vector<5x40xf32>, vector<40x1xf32>, vector<5x1xf32> -> vector<5x1xf32>
    %cst_66 = arith.constant 3.125000e-02 : f32
    %130 = vector.broadcast %cst_66 : f32 to vector<5x1xf32>
    %131 = arith.mulf %129, %130 : vector<5x1xf32>
    %cst_67 = arith.constant dense<0.000000e+00> : vector<5x1xf32>
    %132 = tpu.matmul %1, %128, %cst_67 {dimension_numbers = #tpu.dot_dimension_numbers<[1], [0], [0], [1], [0, 0, 1, 1], [], []>} : vector<5x40xf32>, vector<40x1xf32>, vector<5x1xf32> -> vector<5x1xf32>
    %cst_68 = arith.constant 3.125000e-02 : f32
    %133 = vector.broadcast %cst_68 : f32 to vector<5x1xf32>
    %134 = arith.mulf %132, %133 : vector<5x1xf32>
    %135 = arith.mulf %131, %131 : vector<5x1xf32>
    %136 = arith.subf %134, %135 : vector<5x1xf32>
    %cst_69 = arith.constant 9.99999974E-6 : f32
    %137 = vector.broadcast %cst_69 : f32 to vector<5x1xf32>
    %138 = arith.addf %136, %137 : vector<5x1xf32>
    %139 = math.rsqrt %138 : vector<5x1xf32>
    %140 = arith.mulf %122, %139 : vector<5x1xf32>
    %141 = arith.mulf %131, %140 : vector<5x1xf32>
    %142 = arith.subf %123, %141 : vector<5x1xf32>
    %cst_70 = arith.constant dense<0.000000e+00> : vector<40x1xf32>
    %143 = tpu.matmul %2, %140, %cst_70 {dimension_numbers = #tpu.dot_dimension_numbers<[1], [0], [0], [1], [0, 0, 1, 1], [], []>} : vector<40x5xf32>, vector<5x1xf32>, vector<40x1xf32> -> vector<40x1xf32>
    %cst_71 = arith.constant dense<0.000000e+00> : vector<40x1xf32>
    %144 = tpu.matmul %2, %142, %cst_71 {dimension_numbers = #tpu.dot_dimension_numbers<[1], [0], [0], [1], [0, 0, 1, 1], [], []>} : vector<40x5xf32>, vector<5x1xf32>, vector<40x1xf32> -> vector<40x1xf32>
    %145 = vector.broadcast %143 : vector<40x1xf32> to vector<40x4xf32>
    %146 = arith.mulf %121, %145 : vector<40x4xf32>
    %147 = vector.broadcast %144 : vector<40x1xf32> to vector<40x4xf32>
    %148 = arith.addf %146, %147 : vector<40x4xf32>
    %c0_72 = arith.constant 0 : index
    %c0_73 = arith.constant 0 : index
    %149 = vector.load %arg12[%c0_72, %c0_73] : memref<16x4xf32, #tpu.memory_space<vmem>>, vector<16x4xf32>
    %cst_74 = arith.constant dense<0.000000e+00> : vector<40x4xf32>
    %150 = tpu.matmul %74, %149, %cst_74 {dimension_numbers = #tpu.dot_dimension_numbers<[1], [0], [0], [1], [0, 0, 1, 1], [], []>} : vector<40x16xf32>, vector<16x4xf32>, vector<40x4xf32> -> vector<40x4xf32>
    %c0_75 = arith.constant 0 : index
    %c0_76 = arith.constant 0 : index
    %151 = vector.load %arg13[%c0_75, %c0_76] : memref<1x4xf32, #tpu.memory_space<vmem>>, vector<1x4xf32>
    %152 = vector.broadcast %151 : vector<1x4xf32> to vector<40x4xf32>
    %153 = arith.addf %150, %152 : vector<40x4xf32>
    %154 = arith.addf %148, %153 : vector<40x4xf32>
    %c0_77 = arith.constant 0 : index
    %c0_78 = arith.constant 0 : index
    %155 = vector.load %arg14[%c0_77, %c0_78] : memref<16x40xf32, #tpu.memory_space<vmem>>, vector<16x40xf32>
    %cst_79 = arith.constant dense<0.000000e+00> : vector<16x4xf32>
    %156 = tpu.matmul %155, %154, %cst_79 {dimension_numbers = #tpu.dot_dimension_numbers<[1], [0], [0], [1], [0, 0, 1, 1], [], []>} : vector<16x40xf32>, vector<40x4xf32>, vector<16x4xf32> -> vector<16x4xf32>
    %c0_80 = arith.constant 0 : index
    %c0_81 = arith.constant 0 : index
    %157 = vector.load %arg15[%c0_80, %c0_81] : memref<16x1xf32, #tpu.memory_space<vmem>>, vector<16x1xf32>
    %158 = vector.broadcast %157 : vector<16x1xf32> to vector<16x4xf32>
    %159 = arith.addf %156, %158 : vector<16x4xf32>
    %cst_82 = arith.constant 5.000000e-01 : f32
    %160 = vector.broadcast %cst_82 : f32 to vector<16x4xf32>
    %161 = arith.mulf %160, %159 : vector<16x4xf32>
    %cst_83 = arith.constant 0.707106769 : f32
    %162 = vector.broadcast %cst_83 : f32 to vector<16x4xf32>
    %163 = arith.mulf %159, %162 : vector<16x4xf32>
    %164 = math.absf %163 : vector<16x4xf32>
    %cst_84 = arith.constant 0.327591091 : f32
    %165 = vector.broadcast %cst_84 : f32 to vector<16x4xf32>
    %166 = arith.mulf %165, %164 : vector<16x4xf32>
    %cst_85 = arith.constant 1.000000e+00 : f32
    %167 = vector.broadcast %cst_85 : f32 to vector<16x4xf32>
    %168 = arith.addf %167, %166 : vector<16x4xf32>
    %cst_86 = arith.constant 1.000000e+00 : f32
    %169 = vector.broadcast %cst_86 : f32 to vector<16x4xf32>
    %170 = arith.divf %169, %168 : vector<16x4xf32>
    %cst_87 = arith.constant 1.06140542 : f32
    %171 = vector.broadcast %cst_87 : f32 to vector<16x4xf32>
    %172 = arith.mulf %171, %170 : vector<16x4xf32>
    %cst_88 = arith.constant -1.45315206 : f32
    %173 = vector.broadcast %cst_88 : f32 to vector<16x4xf32>
    %174 = arith.addf %172, %173 : vector<16x4xf32>
    %175 = arith.mulf %174, %170 : vector<16x4xf32>
    %cst_89 = arith.constant 1.42141378 : f32
    %176 = vector.broadcast %cst_89 : f32 to vector<16x4xf32>
    %177 = arith.addf %175, %176 : vector<16x4xf32>
    %178 = arith.mulf %177, %170 : vector<16x4xf32>
    %cst_90 = arith.constant -0.284496725 : f32
    %179 = vector.broadcast %cst_90 : f32 to vector<16x4xf32>
    %180 = arith.addf %178, %179 : vector<16x4xf32>
    %181 = arith.mulf %180, %170 : vector<16x4xf32>
    %cst_91 = arith.constant 0.254829586 : f32
    %182 = vector.broadcast %cst_91 : f32 to vector<16x4xf32>
    %183 = arith.addf %181, %182 : vector<16x4xf32>
    %184 = arith.mulf %183, %170 : vector<16x4xf32>
    %cst_92 = arith.constant 0.000000e+00 : f32
    %185 = vector.broadcast %cst_92 : f32 to vector<16x4xf32>
    %186 = arith.subf %185, %164 : vector<16x4xf32>
    %187 = arith.mulf %186, %164 : vector<16x4xf32>
    %188 = math.exp %187 : vector<16x4xf32>
    %189 = arith.mulf %184, %188 : vector<16x4xf32>
    %cst_93 = arith.constant 1.000000e+00 : f32
    %190 = vector.broadcast %cst_93 : f32 to vector<16x4xf32>
    %191 = arith.subf %190, %189 : vector<16x4xf32>
    %cst_94 = arith.constant 0.000000e+00 : f32
    %192 = vector.broadcast %cst_94 : f32 to vector<16x4xf32>
    %193 = arith.cmpf oge, %163, %192 : vector<16x4xf32>
    %cst_95 = arith.constant 0.000000e+00 : f32
    %194 = vector.broadcast %cst_95 : f32 to vector<16x4xf32>
    %195 = arith.subf %194, %191 : vector<16x4xf32>
    %196 = arith.select %193, %191, %195 : vector<16x4xi1>, vector<16x4xf32>
    %cst_96 = arith.constant 1.000000e+00 : f32
    %197 = vector.broadcast %cst_96 : f32 to vector<16x4xf32>
    %198 = arith.addf %197, %196 : vector<16x4xf32>
    %199 = arith.mulf %161, %198 : vector<16x4xf32>
    %c0_97 = arith.constant 0 : index
    %c0_98 = arith.constant 0 : index
    %200 = vector.load %arg18[%c0_97, %c0_98] : memref<2x16xf32, #tpu.memory_space<vmem>>, vector<2x16xf32>
    %c0_99 = arith.constant 0 : index
    %c0_100 = arith.constant 0 : index
    %201 = vector.load %arg19[%c0_99, %c0_100] : memref<16x2xf32, #tpu.memory_space<vmem>>, vector<16x2xf32>
    %c0_101 = arith.constant 0 : index
    %c0_102 = arith.constant 0 : index
    %202 = vector.load %arg16[%c0_101, %c0_102] : memref<2x1xf32, #tpu.memory_space<vmem>>, vector<2x1xf32>
    %c0_103 = arith.constant 0 : index
    %c0_104 = arith.constant 0 : index
    %203 = vector.load %arg17[%c0_103, %c0_104] : memref<2x1xf32, #tpu.memory_space<vmem>>, vector<2x1xf32>
    %cst_105 = arith.constant dense<0.000000e+00> : vector<16xf32>
    %204 = vector.multi_reduction <add>, %199, %cst_105 [1] : vector<16x4xf32> to vector<16xf32>
    %205 = vector.shape_cast %204 : vector<16xf32> to vector<16x1xf32>
    %206 = arith.mulf %199, %199 : vector<16x4xf32>
    %cst_106 = arith.constant dense<0.000000e+00> : vector<16xf32>
    %207 = vector.multi_reduction <add>, %206, %cst_106 [1] : vector<16x4xf32> to vector<16xf32>
    %208 = vector.shape_cast %207 : vector<16xf32> to vector<16x1xf32>
    %cst_107 = arith.constant dense<0.000000e+00> : vector<2x1xf32>
    %209 = tpu.matmul %200, %205, %cst_107 {dimension_numbers = #tpu.dot_dimension_numbers<[1], [0], [0], [1], [0, 0, 1, 1], [], []>} : vector<2x16xf32>, vector<16x1xf32>, vector<2x1xf32> -> vector<2x1xf32>
    %cst_108 = arith.constant 3.125000e-02 : f32
    %210 = vector.broadcast %cst_108 : f32 to vector<2x1xf32>
    %211 = arith.mulf %209, %210 : vector<2x1xf32>
    %cst_109 = arith.constant dense<0.000000e+00> : vector<2x1xf32>
    %212 = tpu.matmul %200, %208, %cst_109 {dimension_numbers = #tpu.dot_dimension_numbers<[1], [0], [0], [1], [0, 0, 1, 1], [], []>} : vector<2x16xf32>, vector<16x1xf32>, vector<2x1xf32> -> vector<2x1xf32>
    %cst_110 = arith.constant 3.125000e-02 : f32
    %213 = vector.broadcast %cst_110 : f32 to vector<2x1xf32>
    %214 = arith.mulf %212, %213 : vector<2x1xf32>
    %215 = arith.mulf %211, %211 : vector<2x1xf32>
    %216 = arith.subf %214, %215 : vector<2x1xf32>
    %cst_111 = arith.constant 9.99999974E-6 : f32
    %217 = vector.broadcast %cst_111 : f32 to vector<2x1xf32>
    %218 = arith.addf %216, %217 : vector<2x1xf32>
    %219 = math.rsqrt %218 : vector<2x1xf32>
    %220 = arith.mulf %202, %219 : vector<2x1xf32>
    %221 = arith.mulf %211, %220 : vector<2x1xf32>
    %222 = arith.subf %203, %221 : vector<2x1xf32>
    %cst_112 = arith.constant dense<0.000000e+00> : vector<16x1xf32>
    %223 = tpu.matmul %201, %220, %cst_112 {dimension_numbers = #tpu.dot_dimension_numbers<[1], [0], [0], [1], [0, 0, 1, 1], [], []>} : vector<16x2xf32>, vector<2x1xf32>, vector<16x1xf32> -> vector<16x1xf32>
    %cst_113 = arith.constant dense<0.000000e+00> : vector<16x1xf32>
    %224 = tpu.matmul %201, %222, %cst_113 {dimension_numbers = #tpu.dot_dimension_numbers<[1], [0], [0], [1], [0, 0, 1, 1], [], []>} : vector<16x2xf32>, vector<2x1xf32>, vector<16x1xf32> -> vector<16x1xf32>
    %225 = vector.broadcast %223 : vector<16x1xf32> to vector<16x4xf32>
    %226 = arith.mulf %199, %225 : vector<16x4xf32>
    %227 = vector.broadcast %224 : vector<16x1xf32> to vector<16x4xf32>
    %228 = arith.addf %226, %227 : vector<16x4xf32>
    %c0_114 = arith.constant 0 : index
    %c0_115 = arith.constant 0 : index
    %229 = vector.load %arg21[%c0_114, %c0_115] : memref<1x16xf32, #tpu.memory_space<vmem>>, vector<1x16xf32>
    %230 = vector.extract_strided_slice %228 {offsets = [0, 0], sizes = [8, 4], strides = [1, 1]} : vector<16x4xf32> to vector<8x4xf32>
    %c0_116 = arith.constant 0 : index
    %c0_117 = arith.constant 0 : index
    %c0_118 = arith.constant 0 : index
    %231 = vector.load %arg20[%c0_116, %c0_117, %c0_118] : memref<2x4x16xf32, #tpu.memory_space<vmem>>, vector<1x4x16xf32>
    %232 = vector.shape_cast %231 : vector<1x4x16xf32> to vector<4x16xf32>
    %cst_119 = arith.constant dense<0.000000e+00> : vector<8x16xf32>
    %233 = tpu.matmul %230, %232, %cst_119 {dimension_numbers = #tpu.dot_dimension_numbers<[1], [0], [0], [1], [0, 0, 1, 1], [], []>} : vector<8x4xf32>, vector<4x16xf32>, vector<8x16xf32> -> vector<8x16xf32>
    %234 = vector.broadcast %229 : vector<1x16xf32> to vector<8x16xf32>
    %235 = arith.addf %234, %233 : vector<8x16xf32>
    %236 = vector.extract_strided_slice %228 {offsets = [8, 0], sizes = [8, 4], strides = [1, 1]} : vector<16x4xf32> to vector<8x4xf32>
    %c1 = arith.constant 1 : index
    %c0_120 = arith.constant 0 : index
    %c0_121 = arith.constant 0 : index
    %237 = vector.load %arg20[%c1, %c0_120, %c0_121] : memref<2x4x16xf32, #tpu.memory_space<vmem>>, vector<1x4x16xf32>
    %238 = vector.shape_cast %237 : vector<1x4x16xf32> to vector<4x16xf32>
    %cst_122 = arith.constant dense<0.000000e+00> : vector<8x16xf32>
    %239 = tpu.matmul %236, %238, %cst_122 {dimension_numbers = #tpu.dot_dimension_numbers<[1], [0], [0], [1], [0, 0, 1, 1], [], []>} : vector<8x4xf32>, vector<4x16xf32>, vector<8x16xf32> -> vector<8x16xf32>
    %240 = arith.addf %235, %239 : vector<8x16xf32>
    %cst_123 = arith.constant 5.000000e-01 : f32
    %241 = vector.broadcast %cst_123 : f32 to vector<8x16xf32>
    %242 = arith.mulf %241, %240 : vector<8x16xf32>
    %cst_124 = arith.constant 0.707106769 : f32
    %243 = vector.broadcast %cst_124 : f32 to vector<8x16xf32>
    %244 = arith.mulf %240, %243 : vector<8x16xf32>
    %245 = math.absf %244 : vector<8x16xf32>
    %cst_125 = arith.constant 0.327591091 : f32
    %246 = vector.broadcast %cst_125 : f32 to vector<8x16xf32>
    %247 = arith.mulf %246, %245 : vector<8x16xf32>
    %cst_126 = arith.constant 1.000000e+00 : f32
    %248 = vector.broadcast %cst_126 : f32 to vector<8x16xf32>
    %249 = arith.addf %248, %247 : vector<8x16xf32>
    %cst_127 = arith.constant 1.000000e+00 : f32
    %250 = vector.broadcast %cst_127 : f32 to vector<8x16xf32>
    %251 = arith.divf %250, %249 : vector<8x16xf32>
    %cst_128 = arith.constant 1.06140542 : f32
    %252 = vector.broadcast %cst_128 : f32 to vector<8x16xf32>
    %253 = arith.mulf %252, %251 : vector<8x16xf32>
    %cst_129 = arith.constant -1.45315206 : f32
    %254 = vector.broadcast %cst_129 : f32 to vector<8x16xf32>
    %255 = arith.addf %253, %254 : vector<8x16xf32>
    %256 = arith.mulf %255, %251 : vector<8x16xf32>
    %cst_130 = arith.constant 1.42141378 : f32
    %257 = vector.broadcast %cst_130 : f32 to vector<8x16xf32>
    %258 = arith.addf %256, %257 : vector<8x16xf32>
    %259 = arith.mulf %258, %251 : vector<8x16xf32>
    %cst_131 = arith.constant -0.284496725 : f32
    %260 = vector.broadcast %cst_131 : f32 to vector<8x16xf32>
    %261 = arith.addf %259, %260 : vector<8x16xf32>
    %262 = arith.mulf %261, %251 : vector<8x16xf32>
    %cst_132 = arith.constant 0.254829586 : f32
    %263 = vector.broadcast %cst_132 : f32 to vector<8x16xf32>
    %264 = arith.addf %262, %263 : vector<8x16xf32>
    %265 = arith.mulf %264, %251 : vector<8x16xf32>
    %cst_133 = arith.constant 0.000000e+00 : f32
    %266 = vector.broadcast %cst_133 : f32 to vector<8x16xf32>
    %267 = arith.subf %266, %245 : vector<8x16xf32>
    %268 = arith.mulf %267, %245 : vector<8x16xf32>
    %269 = math.exp %268 : vector<8x16xf32>
    %270 = arith.mulf %265, %269 : vector<8x16xf32>
    %cst_134 = arith.constant 1.000000e+00 : f32
    %271 = vector.broadcast %cst_134 : f32 to vector<8x16xf32>
    %272 = arith.subf %271, %270 : vector<8x16xf32>
    %cst_135 = arith.constant 0.000000e+00 : f32
    %273 = vector.broadcast %cst_135 : f32 to vector<8x16xf32>
    %274 = arith.cmpf oge, %244, %273 : vector<8x16xf32>
    %cst_136 = arith.constant 0.000000e+00 : f32
    %275 = vector.broadcast %cst_136 : f32 to vector<8x16xf32>
    %276 = arith.subf %275, %272 : vector<8x16xf32>
    %277 = arith.select %274, %272, %276 : vector<8x16xi1>, vector<8x16xf32>
    %cst_137 = arith.constant 1.000000e+00 : f32
    %278 = vector.broadcast %cst_137 : f32 to vector<8x16xf32>
    %279 = arith.addf %278, %277 : vector<8x16xf32>
    %280 = arith.mulf %242, %279 : vector<8x16xf32>
    %c0_138 = arith.constant 0 : index
    %c0_139 = arith.constant 0 : index
    %281 = vector.load %arg22[%c0_138, %c0_139] : memref<16x8xf32, #tpu.memory_space<vmem>>, vector<16x8xf32>
    %cst_140 = arith.constant dense<0.000000e+00> : vector<8x8xf32>
    %282 = tpu.matmul %280, %281, %cst_140 {dimension_numbers = #tpu.dot_dimension_numbers<[1], [0], [0], [1], [0, 0, 1, 1], [], []>} : vector<8x16xf32>, vector<16x8xf32>, vector<8x8xf32> -> vector<8x8xf32>
    %c0_141 = arith.constant 0 : index
    %c0_142 = arith.constant 0 : index
    %283 = vector.load %arg23[%c0_141, %c0_142] : memref<1x8xf32, #tpu.memory_space<vmem>>, vector<1x8xf32>
    %284 = vector.broadcast %283 : vector<1x8xf32> to vector<8x8xf32>
    %285 = arith.addf %282, %284 : vector<8x8xf32>
    %c0_143 = arith.constant 0 : index
    %c0_144 = arith.constant 0 : index
    %286 = vector.load %arg24[%c0_143, %c0_144] : memref<8x8xf32, #tpu.memory_space<vmem>>, vector<8x8xf32>
    tpu.vector_store %arg24[%c0_143, %c0_144], %285 {strides = array<i32>} : memref<8x8xf32, #tpu.memory_space<vmem>>, vector<8x8xf32>,
    return
  }
}

</mosaic_0001>

<bundles_post_ra>
// kernel: _lambda_.1
= control target key start
LH: loop header
LB: loop body
LE: loop exit
PB: predicated region body
PF: predicated region fallthrough
CT: control target
= control target key end

     0   :  { %s3636_s0 = inlined_call_operand.vmem [shape: f32[40,4], index: 0, kind: input, shape index: {}]   ;;  %s3637_s1 = inlined_call_operand.vmem [shape: f32[4,16], index: 1, kind: input, shape index: {}]   ;;  %s3638_s2 = inlined_call_operand.vmem [shape: f32[1,16], index: 2, kind: input, shape index: {}]   ;;  %s3639_s3 = inlined_call_operand.vmem [shape: f32[5,1], index: 3, kind: input, shape index: {}, may-alias: {3,9}]   ;;  %s3640_s4 = inlined_call_operand.vmem [shape: f32[5,1], index: 4, kind: input, shape index: {}, may-alias: {4,10}]   ;;  %s3641_s5 = inlined_call_operand.vmem [shape: f32[5,40], index: 5, kind: input, shape index: {}]   ;;  %s3642_s6 = inlined_call_operand.vmem [shape: f32[40,5], index: 6, kind: input, shape index: {}]   ;;  %s3643_s7 = inlined_call_operand.vmem [shape: f32[40,16], index: 7, kind: input, shape index: {}]   ;;  %s3644_s8 = inlined_call_operand.vmem [shape: f32[40,1], index: 8, kind: input, shape index: {}]   ;;  %s3645_s9 = inlined_call_operand.vmem [shape: f32[5,1], index: 9, kind: input, shape index: {}, may-alias: {3,9}]   ;;  %s3646_s10 = inlined_call_operand.vmem [shape: f32[5,1], index: 10, kind: input, shape index: {}, may-alias: {4,10}]   ;;  %s3647_s11 = inlined_call_operand.vmem [shape: f32[16,4], index: 11, kind: input, shape index: {}]   ;;  %s3648_s12 = inlined_call_operand.vmem [shape: f32[16,4], index: 12, kind: input, shape index: {}]   ;;  %s3649_s13 = inlined_call_operand.vmem [shape: f32[1,4], index: 13, kind: input, shape index: {}]   ;;  %s3650_s14 = inlined_call_operand.vmem [shape: f32[16,40], index: 14, kind: input, shape index: {}]   ;;  %s3651_s15 = inlined_call_operand.vmem [shape: f32[16,1], index: 15, kind: input, shape index: {}]   ;;  %s3652_s16 = inlined_call_operand.vmem [shape: f32[2,1], index: 16, kind: input, shape index: {}]   ;;  %s3653_s17 = inlined_call_operand.vmem [shape: f32[2,1], index: 17, kind: input, shape index: {}]   ;;  %s3654_s18 = inlined_call_operand.vmem [shape: f32[2,16], index: 18, kind: input, shape index: {}]   ;;  %s3655_s19 = inlined_call_operand.vmem [shape: f32[16,2], index: 19, kind: input, shape index: {}]   ;;  %s3656_s20 = inlined_call_operand.vmem [shape: f32[2,4,16], index: 20, kind: input, shape index: {}]   ;;  %s3657_s21 = inlined_call_operand.vmem [shape: f32[1,16], index: 21, kind: input, shape index: {}]   ;;  %s3658_s22 = inlined_call_operand.vmem [shape: f32[16,8], index: 22, kind: input, shape index: {}]   ;;  %s3659_s23 = inlined_call_operand.vmem [shape: f32[1,8], index: 23, kind: input, shape index: {}]   ;;  %s3660_s24 = inlined_call_operand.hbm [shape: f32[8,8], index: 24, kind: output, shape index: {}]  }
   0x1   :  { %3665 = sst [smem:[#allocation5_spill]] %s3636_s0 }
   0x2   :  { %3666 = sst [smem:[#allocation6_spill]] %s3637_s1 }
   0x3   :  { %3667 = sst [smem:[#allocation7_spill]] %s3638_s2 }
   0x4   :  { %3668 = sst [smem:[#allocation8_spill]] %s3639_s3 }
   0x5   :  { %3669 = sst [smem:[#allocation9_spill]] %s3640_s4 }
   0x6   :  { %3670 = sst [smem:[#allocation10_spill]] %s3641_s5 }
   0x7   :  { %3671 = sst [smem:[#allocation11_spill]] %s3642_s6 }
   0x8   :  { %3672 = sst [smem:[#allocation12_spill]] %s3643_s7 }
   0x9   :  { %3673 = sst [smem:[#allocation13_spill]] %s3644_s8 }
   0xa   :  { %s3674_s27 = sld [smem:[#allocation6_spill]]  ;;  %vm113_vm0 = vcmask 1043456   ;;  %s3675_s2 = sld [smem:[#allocation5_spill]]  ;;  %v2952_v2 = vmov 0.0   ;;  %vm2953_vm1 = vmmov 0   ;;  %vm97_vm2 = vcmask 31744  }
   0xb   :  { %2584 = vmatprep.subr.mxu0 %v2952_v2  ;;  %2586 = vmatprep.mubr.msk.f32.mxu0 %vm2953_vm1, %v2952_v2 }
   0xc   :  { %2611 = vmatprep.mubr.msk.f32.mxu1 %vm2953_vm1, %v2952_v2 }
  0x10   :  { %v89_v0 = vld [vmem:[%s3674_s27] sm:$0xf] }
  0x11   :  { %v78_v1 = vld [vmem:[%s3675_s2] sm:$0xff]  ;;  %2585 = vmatpush3.msk.msra.mxu0 %vm113_vm0, %v89_v0 }
  0x12   :  { %29 = vsyncpa [#allocation3], 0  ;;  %2587 = vmatmul.mubr.msk.f32.vlgmr.msra.gmra.mrb[0].mxu0 %vm97_vm2, %v78_v1  ;;  %2627 = vmatprep.subr.mxu0 %v2952_v2  ;;  %v79_v3 = vld [vmem:[%s3675_s2 + $0x8] sm:$0xff]  ;;  %v80_v4 = vld [vmem:[%s3675_s2 + $0x10] sm:$0xff]  ;;  %s3676_s26 = sld [smem:[#allocation7_spill]]  ;;  %vm344_vm4 = vcmask 130048  }
  0x13   :  { %2589 = vmatprep.mubr.msk.f32.mxu0 %vm2953_vm1, %v2952_v2  ;;  %v81_v5 = vld [vmem:[%s3675_s2 + $0x18] sm:$0xff]  ;;  %v82_v6 = vld [vmem:[%s3675_s2 + $0x20] sm:$0xff]  ;;  %s3677_s6 = sld [smem:[#allocation10_spill]]  ;;  %vm380_vm9 = vcmask 326656   ;;  %s3678_s0 = sld [smem:[#allocation8_spill]]  ;;  %vm549_vm10 = vcmask 1044480  }
  0x14   :  { %s3679_s3 = sld [smem:[#allocation11_spill]]  ;;  %vm533_vm11 = vcmask 39936   ;;  %s3680_s4 = sld [smem:[#allocation9_spill]] }
  0x15   :  { %s3681_s8 = sld [smem:[#allocation13_spill]]  ;;  %s3682_s7 = sld [smem:[#allocation12_spill]] }
  0x16   :  { %2590 = vmatmul.mubr.msk.f32.gmra.mrb[2].mxu0 %vm97_vm2, %v79_v3  ;;  %s2956_s30 = smov [#allocation2]  }
  0x17   :  { %2592 = vmatprep.mubr.msk.f32.mxu0 %vm2953_vm1, %v2952_v2 }
  0x18   :  { %v2426_v7 = vld [vmem:[%s3676_s26] ss:$0 sm:$0xff] }
  0x1a   :  { %2593 = vmatmul.mubr.msk.f32.gmra.mrb[4].mxu0 %vm97_vm2, %v80_v4 }
  0x1b   :  { %2595 = vmatprep.mubr.msk.f32.mxu0 %vm2953_vm1, %v2952_v2 }
  0x1e   :  { %2596 = vmatmul.mubr.msk.f32.gmra.mrb[6].mxu0 %vm97_vm2, %v81_v5 }
  0x1f   :  { %2598 = vmatprep.mubr.msk.f32.mxu0 %vm2953_vm1, %v2952_v2 }
  0x22   :  { %2599 = vmatmul.mubr.msk.f32.gmra.mrb[8].mxu0 %vm97_vm2, %v82_v6 }
  0x23   :  { %2629 = vmatprep.mubr.msk.f32.mxu0 %vm2953_vm1, %v2952_v2 }
  0xe5   :  { %v183_v8 = vpop.f32.mrb[0].mxu0 }
  0xe6   :  { %v3125_v9 = vadd.f32 %v2426_v7, %v183_v8  ;;  %v2588_v10 = vpop.f32.mrb[1].mxu0 }
  0xe8   :  { %v3128_v11 = vmul.f32 0.70710677, %v3125_v9 }
  0xe9   :  { %v188_v12 = vpop.f32.mrb[2].mxu0 }
  0xea   :  { %v217_v13 = vand.u32 2147483647, %v3128_v11  ;;  %v3131_v14 = vadd.f32 %v2426_v7, %v188_v12  ;;  %v2591_v15 = vpop.f32.mrb[3].mxu0  ;;  %vm317_vm3 = vcmp.ge.f32.partialorder %v3128_v11, 0.0 }
  0xec   :  { %v222_v16 = vmul.f32 0.3275911, %v217_v13  ;;  %v3134_v17 = vmul.f32 0.70710677, %v3131_v14  ;;  %v287_v33 = vsub.f32 0.0, %v217_v13 }
  0xed   :  { %v193_v18 = vpop.f32.mrb[4].mxu0 }
  0xee   :  { %v227_v19 = vadd.f32 1.0, %v222_v16  ;;  %v218_v20 = vand.u32 2147483647, %v3134_v17  ;;  %v2594_v21 = vpop.f32.mrb[5].mxu0  ;;  %v3137_v22 = vadd.f32 %v2426_v7, %v193_v18  ;;  %v292_v42 = vmul.f32 %v287_v33, %v217_v13 }
  0xef   :  { %vm318_vm5 = vcmp.ge.f32.partialorder %v3134_v17, 0.0 }
  0xf0   :  { %2870 = vrcp.f32 %v227_v19  ;;  %v223_v23 = vmul.f32 0.3275911, %v218_v20  ;;  %v3140_v24 = vmul.f32 0.70710677, %v3137_v22  ;;  %v288_v40 = vsub.f32 0.0, %v218_v20 }
  0xf1   :  { %v198_v25 = vpop.f32.mrb[6].mxu0  ;;  %v297_v50 = vmul.f32 1.442695, %v292_v42 }
  0xf2   :  { %v228_v26 = vadd.f32 1.0, %v223_v23  ;;  %v3142_v27 = vadd.f32 %v2426_v7, %v198_v25  ;;  %v2597_v28 = vpop.f32.mrb[7].mxu0  ;;  %v219_v29 = vand.u32 2147483647, %v3140_v24  ;;  %v293_v47 = vmul.f32 %v288_v40, %v218_v20 }
  0xf3   :  { %vm319_vm6 = vcmp.ge.f32.partialorder %v3140_v24, 0.0 }
  0xf4   :  { %2872 = vrcp.f32 %v228_v26  ;;  %v3146_v30 = vmul.f32 0.70710677, %v3142_v27  ;;  %v224_v31 = vmul.f32 0.3275911, %v219_v29  ;;  %v289_v51 = vsub.f32 0.0, %v219_v29 }
  0xf5   :  { %v203_v32 = vpop.f32.mrb[8].mxu0  ;;  %v299_v56 = vmul.f32 1.442695, %v293_v47 }
  0xf6   :  { %v220_v34 = vand.u32 2147483647, %v3146_v30  ;;  %v3149_v35 = vadd.f32 %v2426_v7, %v203_v32  ;;  %v2600_v36 = vpop.f32.mrb[9].mxu0  ;;  %v229_v37 = vadd.f32 1.0, %v224_v31  ;;  %v294_v58 = vmul.f32 %v289_v51, %v219_v29 }
  0xf7   :  { %vm320_vm7 = vcmp.ge.f32.partialorder %v3146_v30, 0.0 }
  0xf8   :  { %v225_v38 = vmul.f32 0.3275911, %v220_v34  ;;  %v3152_v39 = vmul.f32 0.70710677, %v3149_v35  ;;  %2874 = vrcp.f32 %v229_v37  ;;  %v290_v59 = vsub.f32 0.0, %v220_v34 }
  0xf9   :  { %v301_v4 = vmul.f32 1.442695, %v294_v58  ;;  %v207_v58 = vmul.f32 0.5, %v3125_v9 }
  0xfa   :  { %v2871_v41 = vpop.eup %2870  ;;  %v230_v43 = vadd.f32 1.0, %v225_v38  ;;  %v221_v44 = vand.u32 2147483647, %v3152_v39  ;;  %v295_v5 = vmul.f32 %v290_v59, %v220_v34  ;;  %vm321_vm8 = vcmp.ge.f32.partialorder %v3152_v39, 0.0 }
  0xfb   :  { %v242_v45 = vmul.f32 1.0614054, %v2871_v41 }
  0xfc   :  { %2876 = vrcp.f32 %v230_v43  ;;  %v226_v46 = vmul.f32 0.3275911, %v221_v44  ;;  %v291_v6 = vsub.f32 0.0, %v221_v44  ;;  %v303_v20 = vmul.f32 1.442695, %v295_v5 }
  0xfd   :  { %v247_v48 = vadd.f32 -1.4531521, %v242_v45 }
  0xfe   :  { %v2873_v49 = vpop.eup %2872  ;;  %v231_v52 = vadd.f32 1.0, %v226_v46  ;;  %v296_v21 = vmul.f32 %v291_v6, %v221_v44 }
  0xff   :  { %v243_v53 = vmul.f32 1.0614054, %v2873_v49  ;;  %v252_v54 = vmul.f32 %v2871_v41, %v247_v48 }
 0x100   :  { %2878 = vrcp.f32 %v231_v52  ;;  %v305_v38 = vmul.f32 1.442695, %v296_v21  ;;  %v209_v21 = vmul.f32 0.5, %v3137_v22 }
 0x101   :  { %v248_v55 = vadd.f32 -1.4531521, %v243_v53  ;;  %v257_v57 = vadd.f32 1.4214138, %v252_v54  ;;  %2880 = vpow2.f32 %v297_v50 }
 0x102   :  { %v2875_v60 = vpop.eup %2874  ;;  %2882 = vpow2.f32 %v299_v56 }
 0x103   :  { %v253_v61 = vmul.f32 %v2873_v49, %v248_v55  ;;  %v262_v62 = vmul.f32 %v2871_v41, %v257_v57  ;;  %v244_v63 = vmul.f32 1.0614054, %v2875_v60  ;;  %2884 = vpow2.f32 %v301_v4 }
 0x104   :  { %2886 = vpow2.f32 %v303_v20 }
 0x105   :  { %v258_v0 = vadd.f32 1.4214138, %v253_v61  ;;  %v267_v1 = vadd.f32 -0.28449672, %v262_v62  ;;  %v249_v7 = vadd.f32 -1.4531521, %v244_v63  ;;  %2888 = vpow2.f32 %v305_v38 }
 0x106   :  { %v2877_v3 = vpop.eup %2876 }
 0x107   :  { %v263_v8 = vmul.f32 %v2873_v49, %v258_v0  ;;  %v245_v10 = vmul.f32 1.0614054, %v2877_v3  ;;  %v272_v12 = vmul.f32 %v2871_v41, %v267_v1  ;;  %v254_v13 = vmul.f32 %v2875_v60, %v249_v7 }
 0x108   :  { %v208_v7 = vmul.f32 0.5, %v3131_v14 }
 0x109   :  { %v268_v15 = vadd.f32 -0.28449672, %v263_v8  ;;  %v250_v16 = vadd.f32 -1.4531521, %v245_v10  ;;  %v277_v18 = vadd.f32 0.2548296, %v272_v12 }
 0x10a   :  { %v2879_v19 = vpop.eup %2878  ;;  %v259_v23 = vadd.f32 1.4214138, %v254_v13 }
 0x10b   :  { %v273_v25 = vmul.f32 %v2873_v49, %v268_v15  ;;  %v255_v26 = vmul.f32 %v2877_v3, %v250_v16  ;;  %v246_v28 = vmul.f32 1.0614054, %v2879_v19  ;;  %v282_v29 = vmul.f32 %v2871_v41, %v277_v18  ;;  %v2881_v31 = vpop.eup %2880 }
 0x10c   :  { %v264_v32 = vmul.f32 %v2875_v60, %v259_v23  ;;  %v2883_v42 = vpop.eup %2882 }
 0x10d   :  { %v278_v33 = vadd.f32 0.2548296, %v273_v25  ;;  %v260_v34 = vadd.f32 1.4214138, %v255_v26  ;;  %v251_v36 = vadd.f32 -1.4531521, %v246_v28  ;;  %v307_v37 = vmul.f32 %v2881_v31, %v282_v29  ;;  %v2885_v57 = vpop.eup %2884 }
 0x10e   :  { %v269_v40 = vadd.f32 -0.28449672, %v264_v32  ;;  %v2887_v6 = vpop.eup %2886 }
 0x10f   :  { %v283_v43 = vmul.f32 %v2873_v49, %v278_v33  ;;  %v265_v45 = vmul.f32 %v2877_v3, %v260_v34  ;;  %v256_v46 = vmul.f32 %v2879_v19, %v251_v36  ;;  %v312_v47 = vsub.f32 1.0, %v307_v37 }
 0x110   :  { %v274_v44 = vmul.f32 %v2875_v60, %v269_v40  ;;  %v211_v36 = vmul.f32 0.5, %v3149_v35 }
 0x111   :  { %v308_v48 = vmul.f32 %v2883_v42, %v283_v43  ;;  %v270_v50 = vadd.f32 -0.28449672, %v265_v45  ;;  %v261_v51 = vadd.f32 1.4214138, %v256_v46  ;;  %v322_v52 = vsub.f32 0.0, %v312_v47 }
 0x112   :  { %v279_v41 = vadd.f32 0.2548296, %v274_v44  ;;  %v2954_v46 = vmov 0.0|0.0  }
 0x113   :  { %v313_v53 = vsub.f32 1.0, %v308_v48  ;;  %v275_v54 = vmul.f32 %v2877_v3, %v270_v50  ;;  %v266_v55 = vmul.f32 %v2879_v19, %v261_v51  ;;  %v327_v56 = vsel %vm317_vm3, %v312_v47, %v322_v52  ;;  %2813 = vmatprep.subr.bf16.mxu1 %v2954_v46 }
 0x114   :  { %v332_v49 = vadd.f32 1.0, %v327_v56  ;;  %v284_v59 = vmul.f32 %v2875_v60, %v279_v41 }
 0x115   :  { %v323_v61 = vsub.f32 0.0, %v313_v53  ;;  %v280_v62 = vadd.f32 0.2548296, %v275_v54  ;;  %v271_v63 = vadd.f32 -0.28449672, %v266_v55 }
 0x116   :  { %v3158_v0 = vmul.f32 %v332_v49, %v207_v58  ;;  %v309_v11 = vmul.f32 %v2885_v57, %v284_v59  ;;  %v3206_v58 = vld [vmem:[%s3677_s6] sm:$0x1f] }
 0x117   :  { %v328_v1 = vsel %vm318_vm5, %v313_v53, %v323_v61  ;;  %v285_v4 = vmul.f32 %v2877_v3, %v280_v62  ;;  %v276_v5 = vmul.f32 %v2879_v19, %v271_v63  ;;  %v2889_v3 = vpop.eup %2888 }
 0x118   :  { %v333_v8 = vadd.f32 1.0, %v328_v1  ;;  %v345_v9 = vsel %vm344_vm4, %v3158_v0, 0.0  ;;  %v314_v60 = vsub.f32 1.0, %v309_v11  ;;  %v360_v38 = vmul.f32 %v3158_v0, %v3158_v0 }
 0x119   :  { %v310_v10 = vmul.f32 %v2887_v6, %v285_v4  ;;  %v281_v12 = vadd.f32 0.2548296, %v276_v5  ;;  %346 = vadd.xlane.f32.xlu0 %v345_v9  ;;  %v2955_v11 = vmov 0  }
 0x11a   :  { %v3163_v13 = vmul.f32 %v333_v8, %v208_v7  ;;  %v324_v17 = vsub.f32 0.0, %v314_v60  ;;  %v365_v43 = vsel %vm344_vm4, %v360_v38, 0.0  ;;  %2868 = vset.pattern.permute.xlu0 %v2955_v11  ;;  %2869 = vset.pattern.permute.xlu1 %v2955_v11 }
 0x11b   :  { %v315_v15 = vsub.f32 1.0, %v310_v10  ;;  %v286_v16 = vmul.f32 %v2879_v19, %v281_v12  ;;  %v210_v19 = vmul.f32 0.5, %v3142_v27  ;;  %v342_v12 = vld [vmem:[%s3678_s0] sm:$0x1f] }
 0x11c   :  { %v348_v18 = vsel %vm344_vm4, %v3163_v13, 0.0  ;;  %v361_v14 = vmul.f32 %v3163_v13, %v3163_v13  ;;  %v329_v20 = vsel %vm319_vm6, %v314_v60, %v324_v17 }
 0x11d   :  { %v325_v23 = vsub.f32 0.0, %v315_v15  ;;  %v311_v25 = vmul.f32 %v2889_v3, %v286_v16  ;;  %349 = vadd.xlane.f32.xlu0 %v348_v18  ;;  %v334_v26 = vadd.f32 1.0, %v329_v20  ;;  %v3226_v16 = vld [vmem:[%s3679_s3] sm:$0xff]  ;;  %v3240_v20 = vld [vmem:[%s3679_s3 + $0x8] sm:$0xff] }
 0x11e   :  { %v368_v32 = vsel %vm344_vm4, %v361_v14, 0.0  ;;  %v343_v3 = vld [vmem:[%s3680_s4] sm:$0x1f] }
 0x11f   :  { %v330_v28 = vsel %vm320_vm7, %v315_v15, %v325_v23  ;;  %v316_v24 = vsub.f32 1.0, %v311_v25  ;;  %v3172_v29 = vmul.f32 %v334_v26, %v209_v21  ;;  %v3255_v21 = vld [vmem:[%s3679_s3 + $0x10] sm:$0xff]  ;;  %v3268_v23 = vld [vmem:[%s3679_s3 + $0x18] sm:$0xff]  ;;  %v3281_v25 = vld [vmem:[%s3679_s3 + $0x20] sm:$0xff]  ;;  %vm1949_vm7 = vcmask 15360   ;;  %s2418_s3 = sshll.u32 %s2956_s30, 4  ;;  %s2419_s3 = int_to_ptr.vmem [resolvable:$true] %s2418_s3 }
 0x120   :  { %v335_v31 = vadd.f32 1.0, %v330_v28  ;;  %p2933_p1 = scmp.lt.s32.totalorder %s2419_s3, %s2419_s3 }
 0x121   :  { %v326_v33 = vsub.f32 0.0, %v316_v24  ;;  %369 = vadd.xlane.f32.xlu0 %v368_v32  ;;  %v351_v22 = vsel %vm344_vm4, %v3172_v29, 0.0  ;;  %v362_v35 = vmul.f32 %v3172_v29, %v3172_v29 }
 0x122   :  { %v3178_v34 = vmul.f32 %v335_v31, %v210_v19  ;;  %352 = vadd.xlane.f32.xlu1 %v351_v22  ;;  %v807_v19 = vld [vmem:[%s3647_s11 + $0x8] sm:$0xff] }
 0x123   :  { %v331_v30 = vsel %vm321_vm8, %v316_v24, %v326_v33  ;;  %v371_v47 = vsel %vm344_vm4, %v362_v35, 0.0  ;;  %v806_v24 = vld [vmem:[%s3647_s11] sm:$0xff]  ;;  %vm1956_vm8 = vcmask 1041408   ;;  %s2928_s11 = scalar_lea.vmem %s2419_s3, 128 }
 0x124   :  { %v336_v37 = vadd.f32 1.0, %v331_v30  ;;  %v354_v27 = vsel %vm344_vm4, %v3178_v34, 0.0  ;;  %v363_v39 = vmul.f32 %v3178_v34, %v3178_v34  ;;  %v2826_v33 = vpack.c.bf16 %v807_v19, %v806_v24  ;;  %p2929_p0 = scmp.ne.s32.totalorder %s2419_s3, %s2928_s11  ;;  %p2934_p2 = scmp.lt.s32.totalorder %s2928_s11, %s2928_s11 }
 0x126   :  { %v3186_v40 = vmul.f32 %v336_v37, %v211_v36  ;;  %355 = vadd.xlane.f32.xlu1 %v354_v27  ;;  %v374_v45 = vsel %vm344_vm4, %v363_v39, 0.0  ;;  %p2935_p3 = por %p2934_p2, %p2933_p1 }
 0x128   :  { %v357_v42 = vsel %vm344_vm4, %v3186_v40, 0.0  ;;  %v364_v44 = vmul.f32 %v3186_v40, %v3186_v40  ;;  %p2936_p4 = pnand %p2935_p3, %p2929_p0 }
 0x129   :  { %358 = vadd.xlane.f32.xlu0 %v357_v42 }
 0x12a   :  { %366 = vadd.xlane.f32.xlu1 %v365_v43  ;;  %v377_v48 = vsel %vm344_vm4, %v364_v44, 0.0 }
 0x12d   :  { %375 = vadd.xlane.f32.xlu0 %v374_v45 }
 0x12e   :  { %372 = vadd.xlane.f32.xlu1 %v371_v47 }
 0x132   :  { %378 = vadd.xlane.f32.xlu1 %v377_v48 }
 0x1a6   :  { %v347_v50 = vpop.xlane.xlu0 %346 }
 0x1aa   :  { %v350_v51 = vpop.xlane.xlu0 %349 }
 0x1ab   :  { %v2814_v52 = vpack.c.bf16 %v350_v51, %v347_v50 }
 0x1ad   :  { %2815 = vmatpush3.bf16.msra.mxu1 %v2814_v52  ;;  %v809_v52 = vld [vmem:[%s3681_s8 + $0x8] sm:$0xff] }
 0x1ae   :  { %2816 = vmatprep.subr.bf16.mxu1 %v2954_v46  ;;  %v370_v53 = vpop.xlane.xlu0 %369 }
 0x1af   :  { %v353_v41 = vpop.xlane.xlu1 %352 }
 0x1b3   :  { %v356_v54 = vpop.xlane.xlu1 %355 }
 0x1b4   :  { %v2817_v55 = vpack.c.bf16 %v356_v54, %v353_v41  ;;  %v811_v41 = vld [vmem:[%s3681_s8 + $0x18] sm:$0xff]  ;;  %v810_v54 = vld [vmem:[%s3681_s8 + $0x10] sm:$0xff] }
 0x1b6   :  { %2818 = vmatpush3.bf16.msra.mxu1 %v2817_v55  ;;  %v359_v56 = vpop.xlane.xlu0 %358  ;;  %v812_v55 = vld [vmem:[%s3681_s8 + $0x20] sm:$0xff] }
 0x1b7   :  { %v367_v57 = vpop.xlane.xlu1 %366  ;;  %2609 = vmatprep.subr.mxu1 %v2952_v2 }
 0x1b8   :  { %v2820_v49 = vpack.c.bf16 %v370_v53, %v367_v57  ;;  %v808_v53 = vld [vmem:[%s3681_s8] sm:$0xff] }
 0x1ba   :  { %2610 = vmatpush3.msra.mxu1 %v359_v56  ;;  %v376_v61 = vpop.xlane.xlu0 %375 }
 0x1bb   :  { %v373_v59 = vpop.xlane.xlu1 %372  ;;  %2612 = vmatmul.mubr.msk.f32.vlgmr.msra.gmra.mrb[0].mxu1 %vm380_vm9, %v3206_v58  ;;  %2819 = vmatprep.subr.bf16.mxu1 %v2954_v46 }
 0x1bc   :  { %2821 = vmatpush3.bf16.msra.mxu1 %v2820_v49  ;;  %2624 = vmatprep.mubr.msk.f32.mxu1 %vm2953_vm1, %v2952_v2  ;;  %v2823_v62 = vpack.c.bf16 %v376_v61, %v373_v59  ;;  %v796_v49 = vld [vmem:[%s3682_s7] sm:$0xff] }
 0x1bd   :  { %2822 = vmatprep.subr.bf16.mxu1 %v2954_v46 }
 0x1bf   :  { %v379_v63 = vpop.xlane.xlu1 %378 }
 0x1c0   :  { %2824 = vmatpush3.bf16.msra.mxu1 %v2823_v62 }
 0x1c1   :  { %2622 = vmatprep.subr.mxu1 %v2952_v2 }
 0x1c4   :  { %2623 = vmatpush3.msra.mxu1 %v379_v63 }
 0x1c5   :  { %2625 = vmatmul.mubr.msk.f32.vlgmr.msra.gmra.mrb[2].mxu1 %vm380_vm9, %v3206_v58  ;;  %2644 = vmatprep.subr.mxu1 %v2952_v2 }
 0x1c6   :  { %2646 = vmatprep.mubr.msk.f32.mxu1 %vm2953_vm1, %v2952_v2 }
 0x28e   :  { %v450_v1 = vpop.f32.mrb[0].mxu1 }
 0x28f   :  { %v2613_v4 = vpop.f32.mrb[1].mxu1  ;;  %v454_v5 = vmul.f32 0.0078125, %v450_v1 }
 0x291   :  { %v526_v7 = vmul.f32 %v454_v5, %v454_v5 }
 0x298   :  { %v521_v6 = vpop.f32.mrb[2].mxu1 }
 0x299   :  { %v525_v8 = vmul.f32 0.0078125, %v521_v6  ;;  %v2626_v9 = vpop.f32.mrb[3].mxu1 }
 0x29b   :  { %v527_v60 = vsub.f32 %v525_v8, %v526_v7 }
 0x29d   :  { %v528_v10 = vadd.f32 1e-05, %v527_v60 }
 0x29f   :  { %2890 = vrsqrt.f32 %v528_v10 }
 0x2a9   :  { %v2891_v17 = vpop.eup %2890 }
 0x2aa   :  { %v530_v15 = vmul.f32 %v2891_v17, %v342_v12 }
 0x2ac   :  { %2628 = vmatpush3.msk.msra.mxu0 %vm549_vm10, %v530_v15  ;;  %v531_v18 = vmul.f32 %v530_v15, %v454_v5 }
 0x2ad   :  { %2630 = vmatmul.mubr.msk.f32.vlgmr.msra.gmra.mrb[10].mxu0 %vm533_vm11, %v3226_v16  ;;  %2825 = vmatprep.subr.bf16.mxu0 %v2954_v46 }
 0x2ae   :  { %v532_v14 = vsub.f32 %v343_v3, %v531_v18  ;;  %2632 = vmatprep.mubr.msk.f32.mxu0 %vm2953_vm1, %v2952_v2  ;;  %2827 = vmatpush3.bf16.msra.mxu0 %v2826_v33 }
 0x2af   :  { %2723 = vmatprep.subr.mxu0 %v2952_v2 }
 0x2b0   :  { %2645 = vmatpush3.msk.msra.mxu1 %vm549_vm10, %v532_v14 }
 0x2b1   :  { %2647 = vmatmul.mubr.msk.f32.vlgmr.msra.gmra.mrb[4].mxu1 %vm533_vm11, %v3226_v16  ;;  %2633 = vmatmul.mubr.msk.f32.gmra.mrb[12].mxu0 %vm533_vm11, %v3240_v20 }
 0x2b2   :  { %2649 = vmatprep.mubr.msk.f32.mxu1 %vm2953_vm1, %v2952_v2  ;;  %2635 = vmatprep.mubr.msk.f32.mxu0 %vm2953_vm1, %v2952_v2 }
 0x2b3   :  { %2828 = vmatprep.subr.bf16.mxu1 %v2954_v46 }
 0x2b5   :  { %2650 = vmatmul.mubr.msk.f32.gmra.mrb[6].mxu1 %vm533_vm11, %v3240_v20  ;;  %2636 = vmatmul.mubr.msk.f32.gmra.mrb[14].mxu0 %vm533_vm11, %v3255_v21 }
 0x2b6   :  { %2652 = vmatprep.mubr.msk.f32.mxu1 %vm2953_vm1, %v2952_v2  ;;  %2638 = vmatprep.mubr.msk.f32.mxu0 %vm2953_vm1, %v2952_v2 }
 0x2b9   :  { %2653 = vmatmul.mubr.msk.f32.gmra.mrb[8].mxu1 %vm533_vm11, %v3255_v21  ;;  %2639 = vmatmul.mubr.msk.f32.gmra.mrb[16].mxu0 %vm533_vm11, %v3268_v23 }
 0x2ba   :  { %2655 = vmatprep.mubr.msk.f32.mxu1 %vm2953_vm1, %v2952_v2  ;;  %2641 = vmatprep.mubr.msk.f32.mxu0 %vm2953_vm1, %v2952_v2 }
 0x2bd   :  { %2656 = vmatmul.mubr.msk.f32.gmra.mrb[10].mxu1 %vm533_vm11, %v3268_v23  ;;  %2642 = vmatmul.mubr.msk.f32.gmra.mrb[18].mxu0 %vm533_vm11, %v3281_v25 }
 0x2be   :  { %2658 = vmatprep.mubr.msk.f32.mxu1 %vm2953_vm1, %v2952_v2  ;;  %2665 = vmatprep.mubr.msk.f32.mxu0 %vm2953_vm1, %v2952_v2 }
 0x2c1   :  { %2659 = vmatmul.mubr.msk.f32.gmra.mrb[12].mxu1 %vm533_vm11, %v3281_v25 }
 0x2c2   :  { %2690 = vmatprep.mubr.msk.f32.mxu1 %vm2953_vm1, %v2952_v2 }
 0x380   :  { %v619_v26 = vpop.f32.mrb[10].mxu0 }
 0x381   :  { %738 = vperm.xlu0 %2868, %v619_v26   ;;  %v2631_v28 = vpop.f32.mrb[11].mxu0 }
 0x382   :  { %v800_v28 = vld [vmem:[%s3682_s7 + $0x20] sm:$0xff] }
 0x384   :  { %v712_v31 = vpop.f32.mrb[4].mxu1  ;;  %v624_v32 = vpop.f32.mrb[12].mxu0 }
 0x385   :  { %768 = vperm.xlu1 %2869, %v712_v31   ;;  %v2648_v22 = vpop.f32.mrb[5].mxu1  ;;  %v2634_v30 = vpop.f32.mrb[13].mxu0 }
 0x388   :  { %v717_v36 = vpop.f32.mrb[6].mxu1  ;;  %v629_v37 = vpop.f32.mrb[14].mxu0 }
 0x389   :  { %743 = vperm.xlu1 %2869, %v624_v32   ;;  %v2651_v27 = vpop.f32.mrb[7].mxu1  ;;  %v2637_v38 = vpop.f32.mrb[15].mxu0 }
 0x38c   :  { %v722_v42 = vpop.f32.mrb[8].mxu1  ;;  %v634_v39 = vpop.f32.mrb[16].mxu0 }
 0x38d   :  { %773 = vperm.xlu1 %2869, %v717_v36   ;;  %v2654_v43 = vpop.f32.mrb[9].mxu1  ;;  %v2640_v35 = vpop.f32.mrb[17].mxu0 }
 0x390   :  { %v727_v45 = vpop.f32.mrb[10].mxu1  ;;  %v639_v47 = vpop.f32.mrb[18].mxu0 }
 0x391   :  { %748 = vperm.xlu1 %2869, %v629_v37   ;;  %v2657_v44 = vpop.f32.mrb[11].mxu1  ;;  %v2643_v48 = vpop.f32.mrb[19].mxu0 }
 0x394   :  { %v732_v50 = vpop.f32.mrb[12].mxu1 }
 0x395   :  { %788 = vperm.xlu0 %2868, %v732_v50   ;;  %778 = vperm.xlu1 %2869, %v722_v42   ;;  %v2660_v51 = vpop.f32.mrb[13].mxu1 }
 0x399   :  { %820 = vperm.xlu0 %2868, %v809_v52   ;;  %753 = vperm.xlu1 %2869, %v634_v39  }
 0x39d   :  { %830 = vperm.xlu0 %2868, %v811_v41   ;;  %783 = vperm.xlu1 %2869, %v727_v45  }
 0x3a1   :  { %758 = vperm.xlu1 %2869, %v639_v47  }
 0x3a5   :  { %815 = vperm.xlu1 %2869, %v808_v53  }
 0x3a9   :  { %825 = vperm.xlu1 %2869, %v810_v54  }
 0x3ad   :  { %835 = vperm.xlu1 %2869, %v812_v55  }
 0x400   :  { %v739_v56 = vpop.permute.xlu0 %738 }
 0x401   :  { %v761_v57 = vmul.f32 %v739_v56, %v3158_v0  ;;  %v797_v0 = vld [vmem:[%s3682_s7 + $0x8] sm:$0xff] }
 0x404   :  { %v769_v59 = vpop.permute.xlu1 %768 }
 0x405   :  { %v3321_v61 = vadd.f32 %v769_v59, %v761_v57 }
 0x407   :  { %v801_v62 = vmul.f32 %v796_v49, %v3321_v61 }
 0x408   :  { %v744_v63 = vpop.permute.xlu1 %743 }
 0x409   :  { %2666 = vmatmul.mubr.msk.f32.vlgmr.msra.gmra.mrb[20].mxu0 %vm344_vm4, %v801_v62  ;;  %v762_v11 = vmul.f32 %v744_v63, %v3163_v13  ;;  %v798_v13 = vld [vmem:[%s3682_s7 + $0x10] sm:$0xff] }
 0x40a   :  { %2668 = vmatprep.mubr.msk.f32.mxu0 %vm2953_vm1, %v2952_v2 }
 0x40c   :  { %v774_v1 = vpop.permute.xlu1 %773 }
 0x40d   :  { %v3331_v4 = vadd.f32 %v774_v1, %v762_v11 }
 0x40f   :  { %v802_v5 = vmul.f32 %v797_v0, %v3331_v4 }
 0x410   :  { %v749_v6 = vpop.permute.xlu1 %748 }
 0x411   :  { %2669 = vmatmul.mubr.msk.f32.gmra.mrb[22].mxu0 %vm344_vm4, %v802_v5  ;;  %v763_v7 = vmul.f32 %v749_v6, %v3172_v29  ;;  %v799_v29 = vld [vmem:[%s3682_s7 + $0x18] sm:$0xff] }
 0x412   :  { %2671 = vmatprep.mubr.msk.f32.mxu0 %vm2953_vm1, %v2952_v2 }
 0x414   :  { %v779_v8 = vpop.permute.xlu1 %778  ;;  %v789_v26 = vpop.permute.xlu0 %788 }
 0x415   :  { %v3341_v9 = vadd.f32 %v779_v8, %v763_v7 }
 0x417   :  { %v803_v60 = vmul.f32 %v798_v13, %v3341_v9 }
 0x418   :  { %v754_v10 = vpop.permute.xlu1 %753  ;;  %v821_v36 = vpop.permute.xlu0 %820 }
 0x419   :  { %2672 = vmatmul.mubr.msk.f32.gmra.mrb[24].mxu0 %vm344_vm4, %v803_v60  ;;  %v764_v12 = vmul.f32 %v754_v10, %v3178_v34 }
 0x41a   :  { %2674 = vmatprep.mubr.msk.f32.mxu0 %vm2953_vm1, %v2952_v2 }
 0x41c   :  { %v784_v17 = vpop.permute.xlu1 %783  ;;  %v831_v57 = vpop.permute.xlu0 %830 }
 0x41d   :  { %v3351_v15 = vadd.f32 %v784_v17, %v764_v12 }
 0x41f   :  { %v804_v3 = vmul.f32 %v799_v29, %v3351_v15 }
 0x420   :  { %v759_v18 = vpop.permute.xlu1 %758 }
 0x421   :  { %v765_v14 = vmul.f32 %v759_v18, %v3186_v40  ;;  %2675 = vmatmul.mubr.msk.f32.gmra.mrb[26].mxu0 %vm344_vm4, %v804_v3 }
 0x422   :  { %2677 = vmatprep.mubr.msk.f32.mxu0 %vm2953_vm1, %v2952_v2 }
 0x423   :  { %v3361_v34 = vadd.f32 %v789_v26, %v765_v14 }
 0x424   :  { %v816_v40 = vpop.permute.xlu1 %815 }
 0x425   :  { %v805_v24 = vmul.f32 %v800_v28, %v3361_v34 }
 0x427   :  { %2678 = vmatmul.mubr.msk.f32.gmra.mrb[28].mxu0 %vm344_vm4, %v805_v24 }
 0x428   :  { %2725 = vmatprep.mubr.msk.f32.mxu0 %vm2953_vm1, %v2952_v2  ;;  %v826_v45 = vpop.permute.xlu1 %825 }
 0x42c   :  { %v836_v10 = vpop.permute.xlu1 %835 }
 0x4dc   :  { %v919_v19 = vpop.f32.mrb[20].mxu0 }
 0x4dd   :  { %v3367_v31 = vadd.f32 %v919_v19, %v816_v40  ;;  %v2667_v32 = vpop.f32.mrb[21].mxu0 }
 0x4df   :  { %v3370_v33 = vmul.f32 0.70710677, %v3367_v31 }
 0x4e1   :  { %v953_v22 = vand.u32 2147483647, %v3370_v33  ;;  %vm1053_vm12 = vcmp.ge.f32.partialorder %v3370_v33, 0.0 }
 0x4e3   :  { %v958_v30 = vmul.f32 0.3275911, %v953_v22  ;;  %v1023_v44 = vsub.f32 0.0, %v953_v22 }
 0x4e4   :  { %v924_v37 = vpop.f32.mrb[22].mxu0 }
 0x4e5   :  { %v963_v27 = vadd.f32 1.0, %v958_v30  ;;  %v3373_v38 = vadd.f32 %v924_v37, %v821_v36  ;;  %v2670_v42 = vpop.f32.mrb[23].mxu0  ;;  %v1028_v53 = vmul.f32 %v1023_v44, %v953_v22 }
 0x4e7   :  { %2892 = vrcp.f32 %v963_v27  ;;  %v3376_v39 = vmul.f32 0.70710677, %v3373_v38  ;;  %v1033_v62 = vmul.f32 1.442695, %v1028_v53 }
 0x4e9   :  { %v954_v43 = vand.u32 2147483647, %v3376_v39  ;;  %vm1054_vm13 = vcmp.ge.f32.partialorder %v3376_v39, 0.0 }
 0x4eb   :  { %v959_v35 = vmul.f32 0.3275911, %v954_v43  ;;  %v1024_v63 = vsub.f32 0.0, %v954_v43 }
 0x4ec   :  { %v929_v47 = vpop.f32.mrb[24].mxu0 }
 0x4ed   :  { %v964_v48 = vadd.f32 1.0, %v959_v35  ;;  %v3379_v50 = vadd.f32 %v929_v47, %v826_v45  ;;  %v2673_v51 = vpop.f32.mrb[25].mxu0  ;;  %v1029_v8 = vmul.f32 %v1024_v63, %v954_v43 }
 0x4ef   :  { %2894 = vrcp.f32 %v964_v48  ;;  %v3382_v52 = vmul.f32 0.70710677, %v3379_v50  ;;  %v1035_v24 = vmul.f32 1.442695, %v1029_v8 }
 0x4f1   :  { %v2893_v41 = vpop.eup %2892  ;;  %v955_v54 = vand.u32 2147483647, %v3382_v52  ;;  %vm1055_vm14 = vcmp.ge.f32.partialorder %v3382_v52, 0.0 }
 0x4f2   :  { %v978_v55 = vmul.f32 1.0614054, %v2893_v41 }
 0x4f3   :  { %v960_v56 = vmul.f32 0.3275911, %v955_v54  ;;  %v1025_v40 = vsub.f32 0.0, %v955_v54 }
 0x4f4   :  { %v983_v49 = vadd.f32 -1.4531521, %v978_v55  ;;  %v934_v59 = vpop.f32.mrb[26].mxu0 }
 0x4f5   :  { %v965_v11 = vadd.f32 1.0, %v960_v56  ;;  %v3385_v0 = vadd.f32 %v934_v59, %v831_v57  ;;  %v2676_v1 = vpop.f32.mrb[27].mxu0  ;;  %v1030_v43 = vmul.f32 %v1025_v40, %v955_v54 }
 0x4f6   :  { %v988_v5 = vmul.f32 %v2893_v41, %v983_v49 }
 0x4f7   :  { %2896 = vrcp.f32 %v965_v11  ;;  %v3388_v6 = vmul.f32 0.70710677, %v3385_v0  ;;  %v1037_v57 = vmul.f32 1.442695, %v1030_v43 }
 0x4f8   :  { %v993_v7 = vadd.f32 1.4214138, %v988_v5  ;;  %2898 = vpow2.f32 %v1033_v62 }
 0x4f9   :  { %v2895_v13 = vpop.eup %2894  ;;  %v956_v60 = vand.u32 2147483647, %v3388_v6  ;;  %vm1056_vm15 = vcmp.ge.f32.partialorder %v3388_v6, 0.0 }
 0x4fa   :  { %v998_v12 = vmul.f32 %v2893_v41, %v993_v7  ;;  %v979_v29 = vmul.f32 1.0614054, %v2895_v13  ;;  %v939_v17 = vpop.f32.mrb[28].mxu0 }
 0x4fb   :  { %v961_v3 = vmul.f32 0.3275911, %v956_v60  ;;  %v3391_v18 = vadd.f32 %v939_v17, %v836_v10  ;;  %v2679_v14 = vpop.f32.mrb[29].mxu0  ;;  %v1026_v49 = vsub.f32 0.0, %v956_v60  ;;  %v943_v17 = vmul.f32 0.5, %v3367_v31 }
 0x4fc   :  { %v1003_v26 = vadd.f32 -0.28449672, %v998_v12  ;;  %v984_v28 = vadd.f32 -1.4531521, %v979_v29 }
 0x4fd   :  { %v966_v19 = vadd.f32 1.0, %v961_v3  ;;  %v3394_v32 = vmul.f32 0.70710677, %v3391_v18 }
 0x4fe   :  { %v1008_v22 = vmul.f32 %v2893_v41, %v1003_v26  ;;  %v989_v30 = vmul.f32 %v2895_v13, %v984_v28 }
 0x4ff   :  { %2900 = vrcp.f32 %v966_v19  ;;  %v957_v36 = vand.u32 2147483647, %v3394_v32  ;;  %vm1057_vm3 = vcmp.ge.f32.partialorder %v3394_v32, 0.0 }
 0x500   :  { %v1013_v37 = vadd.f32 0.2548296, %v1008_v22  ;;  %v994_v27 = vadd.f32 1.4214138, %v989_v30  ;;  %2902 = vpow2.f32 %v1035_v24 }
 0x501   :  { %v2897_v42 = vpop.eup %2896  ;;  %v962_v35 = vmul.f32 0.3275911, %v957_v36  ;;  %v1027_v24 = vsub.f32 0.0, %v957_v36 }
 0x502   :  { %v1018_v45 = vmul.f32 %v2893_v41, %v1013_v37  ;;  %v999_v47 = vmul.f32 %v2895_v13, %v994_v27  ;;  %v980_v44 = vmul.f32 1.0614054, %v2897_v42  ;;  %v2899_v48 = vpop.eup %2898  ;;  %v1031_v41 = vmul.f32 %v1026_v49, %v956_v60 }
 0x503   :  { %v967_v51 = vadd.f32 1.0, %v962_v35  ;;  %v1032_v35 = vmul.f32 %v1027_v24, %v957_v36 }
 0x504   :  { %v1043_v53 = vmul.f32 %v2899_v48, %v1018_v45  ;;  %v1004_v55 = vadd.f32 -0.28449672, %v999_v47  ;;  %v985_v56 = vadd.f32 -1.4531521, %v980_v44  ;;  %v1039_v19 = vmul.f32 1.442695, %v1031_v41 }
 0x505   :  { %2904 = vrcp.f32 %v967_v51  ;;  %v944_v51 = vmul.f32 0.5, %v3373_v38  ;;  %v1041_v49 = vmul.f32 1.442695, %v1032_v35 }
 0x506   :  { %v1048_v59 = vsub.f32 1.0, %v1043_v53  ;;  %v1009_v62 = vmul.f32 %v2895_v13, %v1004_v55  ;;  %v990_v63 = vmul.f32 %v2897_v42, %v985_v56  ;;  %2906 = vpow2.f32 %v1037_v57 }
 0x507   :  { %2908 = vpow2.f32 %v1039_v19 }
 0x508   :  { %v1058_v11 = vsub.f32 0.0, %v1048_v59  ;;  %v1014_v1 = vadd.f32 0.2548296, %v1009_v62  ;;  %v995_v5 = vadd.f32 1.4214138, %v990_v63  ;;  %2910 = vpow2.f32 %v1041_v49 }
 0x509   :  { %v2901_v7 = vpop.eup %2900 }
 0x50a   :  { %v1063_v54 = vsel %vm1053_vm12, %v1048_v59, %v1058_v11  ;;  %v1019_v8 = vmul.f32 %v2895_v13, %v1014_v1  ;;  %v1000_v10 = vmul.f32 %v2897_v42, %v995_v5  ;;  %v981_v12 = vmul.f32 1.0614054, %v2901_v7  ;;  %v2903_v29 = vpop.eup %2902 }
 0x50b   :  { %v1068_v3 = vadd.f32 1.0, %v1063_v54 }
 0x50c   :  { %v1044_v14 = vmul.f32 %v2903_v29, %v1019_v8  ;;  %v1005_v26 = vadd.f32 -0.28449672, %v1000_v10  ;;  %v986_v28 = vadd.f32 -1.4531521, %v981_v12  ;;  %v945_v10 = vmul.f32 0.5, %v3379_v50 }
 0x50d   :  { %v3399_v40 = vmul.f32 %v1068_v3, %v943_v17 }
 0x50e   :  { %v1049_v22 = vsub.f32 1.0, %v1044_v14  ;;  %v1010_v30 = vmul.f32 %v2897_v42, %v1005_v26  ;;  %v991_v33 = vmul.f32 %v2901_v7, %v986_v28 }
 0x50f   :  { %v2905_v37 = vpop.eup %2904  ;;  %v1080_v13 = vsel %vm97_vm2, %v3399_v40, 0.0 }
 0x510   :  { %v1059_v60 = vsub.f32 0.0, %v1049_v22  ;;  %v1015_v27 = vadd.f32 0.2548296, %v1010_v30  ;;  %v996_v43 = vadd.f32 1.4214138, %v991_v33  ;;  %1081 = vadd.xlane.f32.xlu0 %v1080_v13  ;;  %v2907_v48 = vpop.eup %2906  ;;  %v946_v30 = vmul.f32 0.5, %v3385_v0 }
 0x511   :  { %v982_v31 = vmul.f32 1.0614054, %v2905_v37  ;;  %v2909_v8 = vpop.eup %2908 }
 0x512   :  { %v1064_v45 = vsel %vm1054_vm13, %v1049_v22, %v1059_v60  ;;  %v1020_v47 = vmul.f32 %v2897_v42, %v1015_v27  ;;  %v1001_v44 = vmul.f32 %v2901_v7, %v996_v43  ;;  %v2911_v50 = vpop.eup %2910 }
 0x513   :  { %v1069_v53 = vadd.f32 1.0, %v1064_v45  ;;  %v987_v55 = vadd.f32 -1.4531521, %v982_v31  ;;  %v1095_v31 = vmul.f32 %v3399_v40, %v3399_v40 }
 0x514   :  { %v1045_v56 = vmul.f32 %v2907_v48, %v1020_v47  ;;  %v1006_v57 = vadd.f32 -0.28449672, %v1001_v44 }
 0x515   :  { %v3405_v59 = vmul.f32 %v1069_v53, %v944_v51  ;;  %v992_v62 = vmul.f32 %v2905_v37, %v987_v55  ;;  %v1100_v0 = vsel %vm97_vm2, %v1095_v31, 0.0 }
 0x516   :  { %v1050_v36 = vsub.f32 1.0, %v1045_v56  ;;  %v1011_v63 = vmul.f32 %v2901_v7, %v1006_v57 }
 0x517   :  { %v997_v11 = vadd.f32 1.4214138, %v992_v62  ;;  %v1083_v39 = vsel %vm97_vm2, %v3405_v59, 0.0  ;;  %v1096_v42 = vmul.f32 %v3405_v59, %v3405_v59 }
 0x518   :  { %v1060_v1 = vsub.f32 0.0, %v1050_v36  ;;  %v1016_v5 = vadd.f32 0.2548296, %v1011_v63  ;;  %1084 = vadd.xlane.f32.xlu1 %v1083_v39 }
 0x519   :  { %v1002_v38 = vmul.f32 %v2905_v37, %v997_v11  ;;  %v1103_v17 = vsel %vm97_vm2, %v1096_v42, 0.0 }
 0x51a   :  { %v1065_v41 = vsel %vm1055_vm14, %v1050_v36, %v1060_v1  ;;  %v1021_v54 = vmul.f32 %v2901_v7, %v1016_v5 }
 0x51b   :  { %v1070_v12 = vadd.f32 1.0, %v1065_v41  ;;  %v1007_v29 = vadd.f32 -0.28449672, %v1002_v38 }
 0x51c   :  { %v1046_v3 = vmul.f32 %v2909_v8, %v1021_v54  ;;  %1104 = vadd.xlane.f32.xlu1 %v1103_v17 }
 0x51d   :  { %v3414_v14 = vmul.f32 %v1070_v12, %v945_v10  ;;  %v1012_v26 = vmul.f32 %v2905_v37, %v1007_v29 }
 0x51e   :  { %v1051_v28 = vsub.f32 1.0, %v1046_v3 }
 0x51f   :  { %v1017_v24 = vadd.f32 0.2548296, %v1012_v26  ;;  %v1086_v52 = vsel %vm97_vm2, %v3414_v14, 0.0  ;;  %v1097_v47 = vmul.f32 %v3414_v14, %v3414_v14 }
 0x520   :  { %v1061_v19 = vsub.f32 0.0, %v1051_v28  ;;  %1087 = vadd.xlane.f32.xlu0 %v1086_v52  ;;  %v1078_v52 = vld [vmem:[%s3645_s9] sm:$0x1f] }
 0x521   :  { %v1022_v7 = vmul.f32 %v2905_v37, %v1017_v24  ;;  %v947_v37 = vmul.f32 0.5, %v3391_v18  ;;  %v1106_v32 = vsel %vm97_vm2, %v1097_v47, 0.0  ;;  %v1631_v47 = vld [vmem:[%s3651_s15] sm:$0xff] }
 0x522   :  { %v1066_v22 = vsel %vm1056_vm15, %v1051_v28, %v1061_v19  ;;  %v1511_v19 = vld [vmem:[%s3648_s12 + $0x8] sm:$0xff] }
 0x523   :  { %v1071_v33 = vadd.f32 1.0, %v1066_v22  ;;  %v1047_v13 = vmul.f32 %v2911_v50, %v1022_v7 }
 0x525   :  { %v3420_v60 = vmul.f32 %v1071_v33, %v946_v30  ;;  %v1052_v27 = vsub.f32 1.0, %v1047_v13  ;;  %v1079_v30 = vld [vmem:[%s3646_s10] sm:$0x1f] }
 0x527   :  { %v1062_v43 = vsub.f32 0.0, %v1052_v27  ;;  %v1089_v35 = vsel %vm97_vm2, %v3420_v60, 0.0  ;;  %v1098_v51 = vmul.f32 %v3420_v60, %v3420_v60 }
 0x528   :  { %1090 = vadd.xlane.f32.xlu0 %v1089_v35 }
 0x529   :  { %v1067_v6 = vsel %vm1057_vm3, %v1052_v27, %v1062_v43  ;;  %v1109_v53 = vsel %vm97_vm2, %v1098_v51, 0.0 }
 0x52a   :  { %v1072_v45 = vadd.f32 1.0, %v1067_v6 }
 0x52c   :  { %v3431_v44 = vmul.f32 %v1072_v45, %v947_v37  ;;  %1101 = vadd.xlane.f32.xlu0 %v1100_v0 }
 0x52e   :  { %v1092_v48 = vsel %vm97_vm2, %v3431_v44, 0.0  ;;  %v1099_v18 = vmul.f32 %v3431_v44, %v3431_v44 }
 0x52f   :  { %1093 = vadd.xlane.f32.xlu1 %v1092_v48 }
 0x530   :  { %1107 = vadd.xlane.f32.xlu0 %v1106_v32  ;;  %v1112_v55 = vsel %vm97_vm2, %v1099_v18, 0.0 }
 0x533   :  { %1110 = vadd.xlane.f32.xlu1 %v1109_v53  ;;  %v1632_v53 = vld [vmem:[%s3651_s15 + $0x8] sm:$0xff] }
 0x534   :  { %1113 = vadd.xlane.f32.xlu0 %v1112_v55 }
 0x59d   :  { %v1082_v56 = vpop.xlane.xlu0 %1081 }
 0x5a5   :  { %v1085_v57 = vpop.xlane.xlu1 %1084 }
 0x5a6   :  { %v2829_v49 = vpack.c.bf16 %v1085_v57, %v1082_v56  ;;  %v1629_v57 = vld [vmem:[%s3650_s14] sm:$0xff] }
 0x5a8   :  { %2830 = vmatpush3.bf16.msra.mxu1 %v2829_v49 }
 0x5a9   :  { %2831 = vmatprep.subr.bf16.mxu1 %v2954_v46  ;;  %v1105_v11 = vpop.xlane.xlu1 %1104 }
 0x5ad   :  { %v1088_v62 = vpop.xlane.xlu0 %1087 }
 0x5b5   :  { %v1091_v36 = vpop.xlane.xlu0 %1090 }
 0x5b6   :  { %v2832_v63 = vpack.c.bf16 %v1091_v36, %v1088_v62 }
 0x5b8   :  { %2833 = vmatpush3.bf16.msra.mxu1 %v2832_v63 }
 0x5b9   :  { %2688 = vmatprep.subr.mxu1 %v2952_v2  ;;  %v1102_v39 = vpop.xlane.xlu0 %1101 }
 0x5ba   :  { %v2835_v1 = vpack.c.bf16 %v1105_v11, %v1102_v39 }
 0x5bc   :  { %v1094_v42 = vpop.xlane.xlu1 %1093 }
 0x5bd   :  { %2689 = vmatpush3.msra.mxu1 %v1094_v42  ;;  %v1108_v5 = vpop.xlane.xlu0 %1107 }
 0x5be   :  { %2691 = vmatmul.mubr.msk.f32.vlgmr.msra.gmra.mrb[14].mxu1 %vm380_vm9, %v3206_v58  ;;  %2834 = vmatprep.subr.bf16.mxu1 %v2954_v46 }
 0x5bf   :  { %2836 = vmatpush3.bf16.msra.mxu1 %v2835_v1  ;;  %2703 = vmatprep.mubr.msk.f32.mxu1 %vm2953_vm1, %v2952_v2 }
 0x5c0   :  { %v1111_v38 = vpop.xlane.xlu1 %1110  ;;  %2837 = vmatprep.subr.bf16.mxu1 %v2954_v46 }
 0x5c1   :  { %v2838_v41 = vpack.c.bf16 %v1111_v38, %v1108_v5  ;;  %v1114_v54 = vpop.xlane.xlu0 %1113 }
 0x5c3   :  { %2839 = vmatpush3.bf16.msra.mxu1 %v2838_v41  ;;  %v2466_v41 = vld [vmem:[%s3649_s13] ss:$0 sm:$0xff] }
 0x5c4   :  { %2701 = vmatprep.subr.mxu1 %v2952_v2 }
 0x5c7   :  { %2702 = vmatpush3.msra.mxu1 %v1114_v54 }
 0x5c8   :  { %2704 = vmatmul.mubr.msk.f32.vlgmr.msra.gmra.mrb[16].mxu1 %vm380_vm9, %v3206_v58  ;;  %2706 = vmatprep.subr.mxu1 %v2952_v2  ;;  %v1510_v58 = vld [vmem:[%s3648_s12] sm:$0xff] }
 0x5c9   :  { %2708 = vmatprep.mubr.msk.f32.mxu1 %vm2953_vm1, %v2952_v2  ;;  %v2841_v22 = vpack.c.bf16 %v1511_v19, %v1510_v58 }
 0x691   :  { %v1181_v8 = vpop.f32.mrb[14].mxu1 }
 0x692   :  { %v2692_v10 = vpop.f32.mrb[15].mxu1  ;;  %v1185_v12 = vmul.f32 0.03125, %v1181_v8 }
 0x694   :  { %v1257_v17 = vmul.f32 %v1185_v12, %v1185_v12 }
 0x69b   :  { %v1252_v29 = vpop.f32.mrb[16].mxu1 }
 0x69c   :  { %v1256_v3 = vmul.f32 0.03125, %v1252_v29  ;;  %v2705_v26 = vpop.f32.mrb[17].mxu1 }
 0x69e   :  { %v1258_v28 = vsub.f32 %v1256_v3, %v1257_v17 }
 0x6a0   :  { %v1259_v24 = vadd.f32 1e-05, %v1258_v28 }
 0x6a2   :  { %2912 = vrsqrt.f32 %v1259_v24 }
 0x6ac   :  { %v2913_v7 = vpop.eup %2912 }
 0x6ad   :  { %v1261_v50 = vmul.f32 %v2913_v7, %v1078_v52 }
 0x6af   :  { %2707 = vmatpush3.msk.msra.mxu1 %vm549_vm10, %v1261_v50  ;;  %v1262_v33 = vmul.f32 %v1261_v50, %v1185_v12 }
 0x6b0   :  { %2709 = vmatmul.mubr.msk.f32.vlgmr.msra.gmra.mrb[18].mxu1 %vm533_vm11, %v3226_v16  ;;  %2840 = vmatprep.subr.bf16.mxu1 %v2954_v46 }
 0x6b1   :  { %2711 = vmatprep.mubr.msk.f32.mxu1 %vm2953_vm1, %v2952_v2  ;;  %v1263_v13 = vsub.f32 %v1079_v30, %v1262_v33  ;;  %2842 = vmatpush3.bf16.msra.mxu1 %v2841_v22 }
 0x6b2   :  { %2796 = vmatprep.subr.mxu1 %v2952_v2 }
 0x6b3   :  { %2724 = vmatpush3.msk.msra.mxu0 %vm549_vm10, %v1263_v13 }
 0x6b4   :  { %2712 = vmatmul.mubr.msk.f32.gmra.mrb[20].mxu1 %vm533_vm11, %v3240_v20  ;;  %2726 = vmatmul.mubr.msk.f32.vlgmr.msra.gmra.mrb[30].mxu0 %vm533_vm11, %v3226_v16 }
 0x6b5   :  { %2714 = vmatprep.mubr.msk.f32.mxu1 %vm2953_vm1, %v2952_v2  ;;  %2728 = vmatprep.mubr.msk.f32.mxu0 %vm2953_vm1, %v2952_v2 }
 0x6b8   :  { %2715 = vmatmul.mubr.msk.f32.gmra.mrb[22].mxu1 %vm533_vm11, %v3255_v21  ;;  %2729 = vmatmul.mubr.msk.f32.gmra.mrb[32].mxu0 %vm533_vm11, %v3240_v20 }
 0x6b9   :  { %2717 = vmatprep.mubr.msk.f32.mxu1 %vm2953_vm1, %v2952_v2  ;;  %2731 = vmatprep.mubr.msk.f32.mxu0 %vm2953_vm1, %v2952_v2 }
 0x6bc   :  { %2718 = vmatmul.mubr.msk.f32.gmra.mrb[24].mxu1 %vm533_vm11, %v3268_v23  ;;  %2732 = vmatmul.mubr.msk.f32.gmra.mrb[34].mxu0 %vm533_vm11, %v3255_v21 }
 0x6bd   :  { %2720 = vmatprep.mubr.msk.f32.mxu1 %vm2953_vm1, %v2952_v2  ;;  %2734 = vmatprep.mubr.msk.f32.mxu0 %vm2953_vm1, %v2952_v2 }
 0x6c0   :  { %2721 = vmatmul.mubr.msk.f32.gmra.mrb[26].mxu1 %vm533_vm11, %v3281_v25  ;;  %2735 = vmatmul.mubr.msk.f32.gmra.mrb[36].mxu0 %vm533_vm11, %v3268_v23 }
 0x6c1   :  { %2737 = vmatprep.mubr.msk.f32.mxu0 %vm2953_vm1, %v2952_v2  ;;  %2744 = vmatprep.mubr.msk.f32.mxu1 %vm2953_vm1, %v2952_v2 }
 0x6c4   :  { %2738 = vmatmul.mubr.msk.f32.gmra.mrb[38].mxu0 %vm533_vm11, %v3281_v25  ;;  %2745 = vmatmul.mubr.msk.f32.vlgmr.msra.gmra.mrb[28].mxu1 %vm344_vm4, %v3321_v61 }
 0x6c5   :  { %2747 = vmatprep.mubr.msk.f32.mxu1 %vm2953_vm1, %v2952_v2  ;;  %2769 = vmatprep.mubr.msk.f32.mxu0 %vm380_vm9, %v1629_v57 }
 0x6c8   :  { %2748 = vmatmul.mubr.msk.f32.gmra.mrb[30].mxu1 %vm344_vm4, %v3331_v4 }
 0x6c9   :  { %2750 = vmatprep.mubr.msk.f32.mxu1 %vm2953_vm1, %v2952_v2 }
 0x6cc   :  { %2751 = vmatmul.mubr.msk.f32.gmra.mrb[32].mxu1 %vm344_vm4, %v3341_v9 }
 0x6cd   :  { %2753 = vmatprep.mubr.msk.f32.mxu1 %vm2953_vm1, %v2952_v2 }
 0x6d0   :  { %2754 = vmatmul.mubr.msk.f32.gmra.mrb[34].mxu1 %vm344_vm4, %v3351_v15 }
 0x6d1   :  { %2756 = vmatprep.mubr.msk.f32.mxu1 %vm2953_vm1, %v2952_v2 }
 0x6d4   :  { %2757 = vmatmul.mubr.msk.f32.gmra.mrb[36].mxu1 %vm344_vm4, %v3361_v34 }
 0x6d5   :  { %2798 = vmatprep.mubr.msk.f32.mxu1 %vm2953_vm1, %v2952_v2 }
 0x783   :  { %v1333_v16 = vpop.f32.mrb[18].mxu1 }
 0x784   :  { %1452 = vperm.xlu1 %2869, %v1333_v16   ;;  %v2710_v20 = vpop.f32.mrb[19].mxu1 }
 0x787   :  { %v1338_v21 = vpop.f32.mrb[20].mxu1  ;;  %v1426_v23 = vpop.f32.mrb[30].mxu0 }
 0x788   :  { %1457 = vperm.xlu0 %2868, %v1338_v21   ;;  %1482 = vperm.xlu1 %2869, %v1426_v23   ;;  %v2713_v25 = vpop.f32.mrb[21].mxu1  ;;  %v2727_v61 = vpop.f32.mrb[31].mxu0 }
 0x78b   :  { %v1343_v4 = vpop.f32.mrb[22].mxu1  ;;  %v1431_v9 = vpop.f32.mrb[32].mxu0 }
 0x78c   :  { %1462 = vperm.xlu0 %2868, %v1343_v4   ;;  %1487 = vperm.xlu1 %2869, %v1431_v9   ;;  %v2716_v15 = vpop.f32.mrb[23].mxu1  ;;  %v2730_v27 = vpop.f32.mrb[33].mxu0 }
 0x78f   :  { %v1348_v43 = vpop.f32.mrb[24].mxu1  ;;  %v1436_v34 = vpop.f32.mrb[34].mxu0 }
 0x790   :  { %1467 = vperm.xlu1 %2869, %v1348_v43   ;;  %1492 = vperm.xlu0 %2868, %v1436_v34   ;;  %v2719_v35 = vpop.f32.mrb[25].mxu1  ;;  %v2733_v31 = vpop.f32.mrb[35].mxu0 }
 0x793   :  { %v1353_v6 = vpop.f32.mrb[26].mxu1  ;;  %v1441_v37 = vpop.f32.mrb[36].mxu0 }
 0x794   :  { %1472 = vperm.xlu0 %2868, %v1353_v6   ;;  %1497 = vperm.xlu1 %2869, %v1441_v37   ;;  %v2722_v45 = vpop.f32.mrb[27].mxu1  ;;  %v2736_v0 = vpop.f32.mrb[37].mxu0 }
 0x797   :  { %v1446_v48 = vpop.f32.mrb[38].mxu0  ;;  %v1600_v51 = vpop.f32.mrb[28].mxu1 }
 0x798   :  { %v2746_v32 = vpop.f32.mrb[29].mxu1  ;;  %1635 = vperm.xlu0 %2868, %v1631_v47   ;;  %1502 = vperm.xlu1 %2869, %v1446_v48   ;;  %v2739_v18 = vpop.f32.mrb[39].mxu0  ;;  %v1601_v29 = vadd.f32 %v2466_v41, %v1600_v51 }
 0x79b   :  { %v1605_v55 = vpop.f32.mrb[30].mxu1 }
 0x79c   :  { %v2749_v56 = vpop.f32.mrb[31].mxu1  ;;  %1640 = vperm.xlu1 %2869, %v1632_v53   ;;  %v1606_v17 = vadd.f32 %v2466_v41, %v1605_v55 }
 0x79f   :  { %v1610_v49 = vpop.f32.mrb[32].mxu1 }
 0x7a0   :  { %v2752_v62 = vpop.f32.mrb[33].mxu1  ;;  %v1611_v22 = vadd.f32 %v2466_v41, %v1610_v49 }
 0x7a3   :  { %v1615_v36 = vpop.f32.mrb[34].mxu1 }
 0x7a4   :  { %v2755_v63 = vpop.f32.mrb[35].mxu1  ;;  %v1616_v30 = vadd.f32 %v2466_v41, %v1615_v36 }
 0x7a7   :  { %v1620_v11 = vpop.f32.mrb[36].mxu1 }
 0x7a8   :  { %v2758_v39 = vpop.f32.mrb[37].mxu1  ;;  %v1621_v23 = vadd.f32 %v2466_v41, %v1620_v11 }
 0x803   :  { %v1453_v42 = vpop.permute.xlu1 %1452 }
 0x804   :  { %v1475_v38 = vmul.f32 %v1453_v42, %v3399_v40 }
 0x807   :  { %v1458_v1 = vpop.permute.xlu0 %1457  ;;  %v1483_v5 = vpop.permute.xlu1 %1482 }
 0x808   :  { %v1476_v54 = vmul.f32 %v1458_v1, %v3405_v59  ;;  %v1505_v8 = vadd.f32 %v1483_v5, %v1475_v38 }
 0x80a   :  { %v1624_v26 = vadd.f32 %v1601_v29, %v1505_v8 }
 0x80b   :  { %v1463_v10 = vpop.permute.xlu0 %1462  ;;  %v1488_v12 = vpop.permute.xlu1 %1487 }
 0x80c   :  { %v1506_v3 = vadd.f32 %v1488_v12, %v1476_v54  ;;  %v1477_v58 = vmul.f32 %v1463_v10, %v3414_v14 }
 0x80e   :  { %v1625_v28 = vadd.f32 %v1606_v17, %v1506_v3 }
 0x80f   :  { %v1468_v24 = vpop.permute.xlu1 %1467  ;;  %v1493_v52 = vpop.permute.xlu0 %1492 }
 0x810   :  { %v2843_v19 = vpack.c.bf16 %v1625_v28, %v1624_v26  ;;  %v1478_v40 = vmul.f32 %v1468_v24, %v3420_v60  ;;  %v1507_v7 = vadd.f32 %v1493_v52, %v1477_v58  ;;  %v1630_v60 = vld [vmem:[%s3650_s14 + $0x8] sm:$0xff] }
 0x812   :  { %2844 = vmatprep.subr.bf16.mxu0 %v2843_v19  ;;  %v1626_v13 = vadd.f32 %v1611_v22, %v1507_v7 }
 0x813   :  { %2846 = vmatpush3.bf16.msra.mxu0 %v2843_v19  ;;  %v1473_v50 = vpop.permute.xlu0 %1472  ;;  %v1498_v59 = vpop.permute.xlu1 %1497 }
 0x814   :  { %v1508_v33 = vadd.f32 %v1498_v59, %v1478_v40  ;;  %v1479_v16 = vmul.f32 %v1473_v50, %v3431_v44 }
 0x816   :  { %v1627_v20 = vadd.f32 %v1616_v30, %v1508_v33 }
 0x817   :  { %v1503_v21 = vpop.permute.xlu1 %1502  ;;  %v1636_v9 = vpop.permute.xlu0 %1635 }
 0x818   :  { %v1509_v25 = vadd.f32 %v1503_v21, %v1479_v16  ;;  %v2847_v61 = vpack.c.bf16 %v1627_v20, %v1626_v13 }
 0x81a   :  { %v1628_v14 = vadd.f32 %v1621_v23, %v1509_v25  ;;  %2848 = vmatprep.subr.bf16.mxu0 %v2847_v61 }
 0x81b   :  { %2850 = vmatpush3.bf16.msra.mxu0 %v2847_v61  ;;  %v1641_v44 = vpop.permute.xlu1 %1640 }
 0x81c   :  { %2767 = vmatprep.subr.mxu0 %v1628_v14 }
 0x81f   :  { %2768 = vmatpush3.msra.mxu0 %v1628_v14 }
 0x820   :  { %2770 = vmatmul.mubr.msk.f32.vlgmr.msra.gmra.mrb[40].mxu0 %vm380_vm9, %v1630_v60  ;;  %2851 = vmatprep.subr.bf16.mxu0 %v2954_v46 }
 0x821   :  { %2776 = vmatprep.mubr.msk.f32.mxu0 %vm2953_vm1, %v2952_v2 }
 0x8f3   :  { %v2771_v4 = vpop.f32.mrb[40].mxu0 }
 0x8f4   :  { %v1721_v15 = vadd.f32 %v2771_v4, %v1641_v44  ;;  %v1715_v27 = vpop.f32.mrb[41].mxu0 }
 0x8f5   :  { %v1716_v43 = vadd.f32 %v1715_v27, %v1636_v9 }
 0x8f6   :  { %v1727_v34 = vmul.f32 0.70710677, %v1721_v15  ;;  %v1725_v59 = vmul.f32 0.5, %v1721_v15  ;;  %v1778_v15 = vld [vmem:[%s3654_s18] sm:$0x3] }
 0x8f7   :  { %v1726_v35 = vmul.f32 0.70710677, %v1716_v43  ;;  %v1724_v33 = vmul.f32 0.5, %v1716_v43 }
 0x8f8   :  { %v1729_v31 = vand.u32 2147483647, %v1727_v34  ;;  %vm1769_vm5 = vcmp.ge.f32.partialorder %v1727_v34, 0.0 }
 0x8f9   :  { %v1728_v6 = vand.u32 2147483647, %v1726_v35  ;;  %vm1768_vm6 = vcmp.ge.f32.partialorder %v1726_v35, 0.0  ;;  %v1779_v35 = vld [vmem:[%s3655_s19] sm:$0xff] }
 0x8fa   :  { %v1731_v37 = vmul.f32 0.3275911, %v1729_v31  ;;  %v1757_v48 = vsub.f32 0.0, %v1729_v31 }
 0x8fb   :  { %v1730_v45 = vmul.f32 0.3275911, %v1728_v6  ;;  %v1756_v51 = vsub.f32 0.0, %v1728_v6 }
 0x8fc   :  { %v1733_v0 = vadd.f32 1.0, %v1731_v37  ;;  %v1759_v18 = vmul.f32 %v1757_v48, %v1729_v31 }
 0x8fd   :  { %v1732_v47 = vadd.f32 1.0, %v1730_v45  ;;  %v1758_v56 = vmul.f32 %v1756_v51, %v1728_v6 }
 0x8fe   :  { %2914 = vrcp.f32 %v1733_v0  ;;  %v1762_v62 = vmul.f32 1.442695, %v1759_v18  ;;  %v1781_v18 = vld [vmem:[%s3652_s16] sm:$0x3] }
 0x8ff   :  { %2916 = vrcp.f32 %v1732_v47  ;;  %v1760_v11 = vmul.f32 1.442695, %v1758_v56  ;;  %v1780_v56 = vld [vmem:[%s3655_s19 + $0x8] sm:$0xff] }
 0x900   :  { %2918 = vpow2.f32 %v1762_v62 }
 0x901   :  { %2920 = vpow2.f32 %v1760_v11 }
 0x908   :  { %v2915_v32 = vpop.eup %2914 }
 0x909   :  { %v2917_v53 = vpop.eup %2916  ;;  %v1739_v55 = vmul.f32 1.0614054, %v2915_v32 }
 0x90a   :  { %v1738_v57 = vmul.f32 1.0614054, %v2917_v53  ;;  %v2919_v3 = vpop.eup %2918 }
 0x90b   :  { %v1741_v49 = vadd.f32 -1.4531521, %v1739_v55  ;;  %v2921_v28 = vpop.eup %2920 }
 0x90c   :  { %v1740_v36 = vadd.f32 -1.4531521, %v1738_v57  ;;  %v1782_v57 = vld [vmem:[%s3653_s17] sm:$0x3] }
 0x90d   :  { %v1743_v63 = vmul.f32 %v2915_v32, %v1741_v49 }
 0x90e   :  { %v1742_v39 = vmul.f32 %v2917_v53, %v1740_v36 }
 0x90f   :  { %v1745_v42 = vadd.f32 1.4214138, %v1743_v63 }
 0x910   :  { %v1744_v1 = vadd.f32 1.4214138, %v1742_v39 }
 0x911   :  { %v1747_v5 = vmul.f32 %v2915_v32, %v1745_v42  ;;  %v2138_v42 = vld [vmem:[%s3656_s20] sm:$0xf] }
 0x912   :  { %v1746_v38 = vmul.f32 %v2917_v53, %v1744_v1  ;;  %2797 = vmatpush3.msk.msra.mxu1 %vm113_vm0, %v2138_v42 }
 0x913   :  { %v1749_v41 = vadd.f32 -0.28449672, %v1747_v5  ;;  %2801 = vmatprep.subr.mxu1 %v2952_v2 }
 0x914   :  { %v1748_v54 = vadd.f32 -0.28449672, %v1746_v38 }
 0x915   :  { %v1751_v8 = vmul.f32 %v2915_v32, %v1749_v41 }
 0x916   :  { %v1750_v10 = vmul.f32 %v2917_v53, %v1748_v54  ;;  %v2485_v54 = vld [vmem:[%s3656_s20 + $0x4] sm:$0xf] }
 0x917   :  { %v1753_v12 = vadd.f32 0.2548296, %v1751_v8 }
 0x918   :  { %v1752_v29 = vadd.f32 0.2548296, %v1750_v10 }
 0x919   :  { %v1755_v17 = vmul.f32 %v2915_v32, %v1753_v12 }
 0x91a   :  { %v1754_v26 = vmul.f32 %v2917_v53, %v1752_v29  ;;  %v2328_v29 = vld [vmem:[%s3658_s22] sm:$0xff] }
 0x91b   :  { %v1765_v24 = vmul.f32 %v2919_v3, %v1755_v17  ;;  %v2329_v17 = vld [vmem:[%s3658_s22 + $0x8] sm:$0xff] }
 0x91c   :  { %v1764_v52 = vmul.f32 %v2921_v28, %v1754_v26  ;;  %v2858_v3 = vpack.c.bf16 %v2329_v17, %v2328_v29 }
 0x91d   :  { %v1767_v58 = vsub.f32 1.0, %v1765_v24 }
 0x91e   :  { %v1766_v19 = vsub.f32 1.0, %v1764_v52 }
 0x91f   :  { %v1771_v40 = vsub.f32 0.0, %v1767_v58 }
 0x920   :  { %v1770_v7 = vsub.f32 0.0, %v1766_v19 }
 0x921   :  { %v1773_v50 = vsel %vm1769_vm5, %v1767_v58, %v1771_v40 }
 0x922   :  { %v1775_v22 = vadd.f32 1.0, %v1773_v50  ;;  %v1772_v30 = vsel %vm1768_vm6, %v1766_v19, %v1770_v7 }
 0x923   :  { %v1774_v13 = vadd.f32 1.0, %v1772_v30 }
 0x924   :  { %v3555_v16 = vmul.f32 %v1775_v22, %v1725_v59 }
 0x925   :  { %v3557_v20 = vmul.f32 %v1774_v13, %v1724_v33 }
 0x926   :  { %v1786_v21 = vsel %vm97_vm2, %v3555_v16, 0.0  ;;  %v1790_v14 = vmul.f32 %v3555_v16, %v3555_v16 }
 0x927   :  { %1787 = vadd.xlane.f32.xlu1 %v1786_v21  ;;  %v1783_v23 = vsel %vm97_vm2, %v3557_v20, 0.0  ;;  %v1789_v25 = vmul.f32 %v3557_v20, %v3557_v20 }
 0x928   :  { %1784 = vadd.xlane.f32.xlu0 %v1783_v23  ;;  %v1794_v60 = vsel %vm97_vm2, %v1790_v14, 0.0 }
 0x929   :  { %v1791_v61 = vsel %vm97_vm2, %v1789_v25, 0.0 }
 0x92c   :  { %1792 = vadd.xlane.f32.xlu0 %v1791_v61 }
 0x930   :  { %1795 = vadd.xlane.f32.xlu0 %v1794_v60 }
 0x9b4   :  { %v1788_v44 = vpop.xlane.xlu1 %1787 }
 0x9b5   :  { %v1785_v4 = vpop.xlane.xlu0 %1784 }
 0x9b6   :  { %v2852_v9 = vpack.c.bf16 %v1788_v44, %v1785_v4 }
 0x9b8   :  { %2853 = vmatpush3.bf16.msra.mxu0 %v2852_v9 }
 0x9b9   :  { %v1793_v27 = vpop.xlane.xlu0 %1792  ;;  %2854 = vmatprep.subr.bf16.mxu0 %v2954_v46 }
 0x9bb   :  { %2777 = vmatmul.mubr.msk.f32.vlgmr.msra.gmra.mrb[42].mxu0 %vm344_vm4, %v1778_v15 }
 0x9bc   :  { %2783 = vmatprep.mubr.msk.f32.mxu0 %vm2953_vm1, %v2952_v2 }
 0x9bd   :  { %v1796_v43 = vpop.xlane.xlu0 %1795 }
 0x9be   :  { %v2855_v34 = vpack.c.bf16 %v1796_v43, %v1793_v27 }
 0x9c0   :  { %2856 = vmatpush3.bf16.msra.mxu0 %v2855_v34  ;;  %v2488_v34 = vld [vmem:[%s3659_s23] ss:$0 sm:$0xff] }
 0x9c3   :  { %2784 = vmatmul.mubr.msk.f32.vlgmr.msra.gmra.mrb[44].mxu0 %vm344_vm4, %v1778_v15 }
 0x9c4   :  { %2788 = vmatprep.mubr.msk.f32.mxu0 %vm1949_vm7, %v1779_v35 }
 0xa8e   :  { %v1866_v31 = vpop.f32.mrb[42].mxu0 }
 0xa8f   :  { %v2778_v6 = vpop.f32.mrb[43].mxu0  ;;  %v1870_v37 = vmul.f32 0.03125, %v1866_v31 }
 0xa91   :  { %v1942_v0 = vmul.f32 %v1870_v37, %v1870_v37 }
 0xa96   :  { %v1937_v45 = vpop.f32.mrb[44].mxu0 }
 0xa97   :  { %v1941_v47 = vmul.f32 0.03125, %v1937_v45  ;;  %v2785_v48 = vpop.f32.mrb[45].mxu0 }
 0xa99   :  { %v1943_v51 = vsub.f32 %v1941_v47, %v1942_v0 }
 0xa9b   :  { %v1944_v32 = vadd.f32 1e-05, %v1943_v51 }
 0xa9d   :  { %2922 = vrsqrt.f32 %v1944_v32 }
 0xaa7   :  { %v2923_v53 = vpop.eup %2922 }
 0xaa8   :  { %v1946_v55 = vmul.f32 %v2923_v53, %v1781_v18 }
 0xaaa   :  { %2786 = vmatprep.subr.msk.mxu0 %vm1956_vm8, %v1946_v55  ;;  %v1947_v49 = vmul.f32 %v1946_v55, %v1870_v37 }
 0xaab   :  { %2787 = vmatpush3.msk.msra.mxu0 %vm1956_vm8, %v1946_v55 }
 0xaac   :  { %2789 = vmatmul.mubr.msk.f32.vlgmr.msra.gmra.mrb[46].mxu0 %vm1949_vm7, %v1780_v56  ;;  %v1948_v62 = vsub.f32 %v1782_v57, %v1947_v49 }
 0xaad   :  { %2793 = vmatprep.mubr.msk.f32.mxu0 %vm1949_vm7, %v1779_v35 }
 0xaae   :  { %2791 = vmatprep.subr.msk.mxu0 %vm1956_vm8, %v1948_v62 }
 0xaaf   :  { %2792 = vmatpush3.msk.msra.mxu0 %vm1956_vm8, %v1948_v62 }
 0xab0   :  { %2794 = vmatmul.mubr.msk.f32.vlgmr.msra.gmra.mrb[48].mxu0 %vm1949_vm7, %v1780_v56  ;;  %2857 = vmatprep.subr.bf16.mxu0 %v2954_v46 }
 0xab1   :  { %2810 = vmatprep.mubr.msk.f32.mxu0 %vm2953_vm1, %v2952_v2  ;;  %2859 = vmatpush3.bf16.msra.mxu0 %v2858_v3 }
 0xb7f   :  { %v2790_v36 = vpop.f32.mrb[46].mxu0 }
 0xb80   :  { %v2026_v63 = vpop.f32.mrb[47].mxu0 }
 0xb81   :  { %2115 = vperm.xlu1 %2869, %v2026_v63  }
 0xb83   :  { %v2795_v11 = vpop.f32.mrb[48].mxu0 }
 0xb84   :  { %v2104_v39 = vpop.f32.mrb[49].mxu0 }
 0xb85   :  { %2120 = vperm.xlu1 %2869, %v2790_v36   ;;  %2127 = vperm.xlu0 %2868, %v2104_v39  }
 0xb89   :  { %2132 = vperm.xlu1 %2869, %v2795_v11  }
 0xc00   :  { %v2116_v46 = vpop.permute.xlu1 %2115 }
 0xc01   :  { %v2123_v1 = vmul.f32 %v2116_v46, %v3557_v20 }
 0xc04   :  { %v2121_v5 = vpop.permute.xlu1 %2120  ;;  %v2128_v38 = vpop.permute.xlu0 %2127 }
 0xc05   :  { %v2135_v41 = vadd.f32 %v2128_v38, %v2123_v1  ;;  %v2124_v10 = vmul.f32 %v2121_v5, %v3555_v16 }
 0xc07   :  { %2799 = vmatmul.mubr.msk.f32.vlgmr.msra.gmra.mrb[38].mxu1 %vm97_vm2, %v2135_v41 }
 0xc08   :  { %2802 = vmatpush3.msk.msra.mxu1 %vm113_vm0, %v2485_v54  ;;  %2803 = vmatprep.mubr.msk.f32.mxu1 %vm2953_vm1, %v2952_v2  ;;  %v2133_v8 = vpop.permute.xlu1 %2132  ;;  %v2484_v2 = vld [vmem:[%s3657_s21] ss:$0 sm:$0xff]  ;;  %vm2410_vm1 = vcmask 64512  }
 0xc09   :  { %v2136_v12 = vadd.f32 %v2133_v8, %v2124_v10 }
 0xc0f   :  { %2804 = vmatmul.mubr.msk.f32.vlgmr.msra.gmra.mrb[38].mxu1 %vm97_vm2, %v2136_v12 }
 0xce2   :  { %v2296_v26 = vpop.f32.mrb[38].mxu1 }
 0xce3   :  { %v2860_v28 = vadd.f32 %v2484_v2, %v2296_v26  ;;  %v2805_v24 = vpop.f32.mrb[39].mxu1 }
 0xce5   :  { %v2302_v52 = vmul.f32 0.70710677, %v2860_v28  ;;  %v2301_v15 = vmul.f32 0.5, %v2860_v28 }
 0xce7   :  { %v2303_v58 = vand.u32 2147483647, %v2302_v52  ;;  %vm2323_vm0 = vcmp.ge.f32.partialorder %v2302_v52, 0.0 }
 0xce9   :  { %v2304_v19 = vmul.f32 0.3275911, %v2303_v58  ;;  %v2317_v7 = vsub.f32 0.0, %v2303_v58 }
 0xceb   :  { %v2305_v40 = vadd.f32 1.0, %v2304_v19  ;;  %v2318_v59 = vmul.f32 %v2317_v7, %v2303_v58 }
 0xced   :  { %2924 = vrcp.f32 %v2305_v40  ;;  %v2319_v33 = vmul.f32 1.442695, %v2318_v59 }
 0xcef   :  { %2926 = vpow2.f32 %v2319_v33 }
 0xcf7   :  { %v2925_v50 = vpop.eup %2924 }
 0xcf8   :  { %v2308_v22 = vmul.f32 1.0614054, %v2925_v50 }
 0xcf9   :  { %v2927_v14 = vpop.eup %2926 }
 0xcfa   :  { %v2309_v30 = vadd.f32 -1.4531521, %v2308_v22 }
 0xcfc   :  { %v2310_v13 = vmul.f32 %v2925_v50, %v2309_v30 }
 0xcfe   :  { %v2311_v16 = vadd.f32 1.4214138, %v2310_v13 }
 0xd00   :  { %v2312_v20 = vmul.f32 %v2925_v50, %v2311_v16 }
 0xd02   :  { %v2313_v21 = vadd.f32 -0.28449672, %v2312_v20 }
 0xd04   :  { %v2314_v23 = vmul.f32 %v2925_v50, %v2313_v21 }
 0xd06   :  { %v2315_v25 = vadd.f32 0.2548296, %v2314_v23 }
 0xd08   :  { %v2316_v61 = vmul.f32 %v2925_v50, %v2315_v25 }
 0xd0a   :  { %v2321_v60 = vmul.f32 %v2927_v14, %v2316_v61 }
 0xd0c   :  { %v2322_v44 = vsub.f32 1.0, %v2321_v60 }
 0xd0e   :  { %v2324_v4 = vsub.f32 0.0, %v2322_v44 }
 0xd10   :  { %v2325_v9 = vsel %vm2323_vm0, %v2322_v44, %v2324_v4 }
 0xd11   :  { %v2326_v27 = vadd.f32 1.0, %v2325_v9 }
 0xd13   :  { %v2327_v43 = vmul.f32 %v2326_v27, %v2301_v15 }
 0xd15   :  { %2811 = vmatmul.mubr.msk.f32.vlgmr.msra.gmra.mrb[50].mxu0 %vm344_vm4, %v2327_v43 }
 0xde8   :  { %v2406_v35 = vpop.f32.mrb[50].mxu0 }
 0xde9   :  { %v2407_v31 = vadd.f32 %v2488_v34, %v2406_v35  ;;  %v2812_v6 = vpop.f32.mrb[51].mxu0 }
 0xdeb   :  { %2411 = vst.msk [vmem:[#allocation2] sm:$0xff] %vm2410_vm1, %v2407_v31 }
 0xdec   :  { %2939 = shalt.err (!%p2936_p4)
}
 0xded   :  { %s2940_s13 = scalar_lea.hbm %s3660_s24, 128 }
 0xdee   :  { %p2941_p5 = scmp.ne.s32.totalorder %s3660_s24, %s2940_s13  ;;  %p2944_p6 = scmp.lt.u32.totalorder %s2940_s13, %s3660_s24 }
 0xdf0   :  { %p2946_p7 = pnand %p2944_p6, %p2941_p5 }
 0xdf2   :  { %2949 = shalt.err (!%p2946_p7)
}
 0xdf3   :  { %2421 = dma.vmem_to_hbm [thread:$0]  %s2419_s3, 128, %s3660_s24, [#allocation3]  }
 0xdf4   :  { %2950 = dma.done.wait [#allocation3], 128  }
 0xdf5   :  { %2951 = vsyncadd [#allocation3], 4294967168 }
 0xdf6   :  { %2425 = vsyncpa [#allocation3], 1 }

</bundles_post_ra>
